<compile_context>
chip_gen: v7x
topology: tpu7x:2x2x1
jax: 0.10.0
libtpu: 0.0.40
codegen_flags: <defaults>
</compile_context>

<pallas_src>
import math
import numpy as np
import jax
import jax.numpy as jnp
from jax.experimental import pallas as pl
from jax.experimental.pallas import tpu as pltpu

B, C, T = 2, 4, 16      # batch, neural channels, time samples
D, H, K = 8, 16, 16     # latent dim, encoder hidden, VQ codebook size
WIN = 11                # SSIM gaussian window size
EPS = 1e-8
NLANES = 128            # lane-dense loss row (first 8 lanes used)

# lane assignments inside the loss row
L_MSE, L_CORR, L_TEMP, L_SSIM, L_ADV, L_PEN, L_REC, L_TOT = range(8)

# Fixed SSIM gaussian window (sigma = 1.5), identical to SSIMLoss.create_window.
_g = [math.exp(-((i - WIN // 2) ** 2) / (2.0 * 1.5 ** 2)) for i in range(WIN)]
_gs = sum(_g)
GAUSS = [v / _gs for v in _g]

# (T, T) Toeplitz matrix implementing the zero-padded depthwise gaussian conv1d as a single
# matmul on the MXU:  gconv(sig) == sig @ GAUSS_MAT   for sig of shape (C, T).
_gm = np.zeros((T, T), np.float32)
_pad = WIN // 2
for _t in range(T):
    for _k in range(WIN):
        _j = _t + _k - _pad
        if 0 <= _j < T:
            _gm[_j, _t] = GAUSS[_k]
GAUSS_MAT = jnp.asarray(_gm)


# ----------------------------------------------------------------------------
# Fused kernel: normalize -> encode -> VQ -> decode(+denorm) -> full NeuralLoss
# ----------------------------------------------------------------------------
def encodec_fused_kernel(x_ref, real_ref,
                         w1_ref, b1_ref, w2_ref, b2_ref,
                         cb_ref, cbt_ref,
                         wd_ref, bd_ref,
                         wdisct_ref, bdisc_ref,
                         gmat_ref,
                         dec_ref, emb_ref, stats_ref, loss_ref):
    # parameters (loaded once; no grid, single invocation)
    w1 = w1_ref[...]                    # (H, C)
    b1 = b1_ref[...]                    # (H, 1)
    w2 = w2_ref[...]                    # (D, H)
    b2 = b2_ref[...]                    # (D, 1)
    cb = cb_ref[...]                    # (K, D)
    cbt = cbt_ref[...]                  # (D, K) pre-transposed in wrapper
    wd = wd_ref[...]                    # (C, D)
    bd = bd_ref[...]                    # (C, 1)
    wdc = wdisct_ref[...]               # (C, 1) pre-transposed in wrapper
    bdc = bdisc_ref[0, 0]
    G = gmat_ref[...]                   # (T, T)

    c_sq = jnp.sum(cb * cb, axis=1, keepdims=True)   # (K, 1), hoisted out of batch loop
    c1 = 0.01 ** 2
    c2 = 0.03 ** 2

    def softplus(v):  # stable: softplus(v) = max(v,0) + log(1 + exp(-|v|))
        return jnp.maximum(v, 0.0) + jnp.log(1.0 + jnp.exp(-jnp.abs(v)))

    mse_a = 0.0
    corr_a = 0.0
    temp_a = 0.0
    ssim_a = 0.0
    adv_a = 0.0
    pen_a = 0.0

    for b in range(B):                  # B=2, statically unrolled
        x = x_ref[b]                    # (C, T)
        r = real_ref[b]                 # (C, T)

        # ---- normalize (torch.std is unbiased: divide by T-1) ----
        mean = jnp.mean(x, axis=1, keepdims=True)                     # (C, 1)
        var = jnp.sum((x - mean) ** 2, axis=1, keepdims=True) / (T - 1)
        std = jnp.sqrt(var)
        xn = (x - mean) / (std + EPS)
        sio = jax.lax.broadcasted_iota(jnp.int32, (C, 2), 1)
        stats_ref[b] = jnp.where(sio == 0, mean, std)                 # cat([mean,std],2)

        # ---- encoder: per-timestep MLP over channels (1x1 conv C->H relu H->D) ----
        h = jnp.maximum(jnp.dot(w1, xn, preferred_element_type=jnp.float32) + b1, 0.0)
        e = jnp.dot(w2, h, preferred_element_type=jnp.float32) + b2   # (D, T)
        emb_ref[b] = e

        # ---- nearest-neighbour VQ; T stays on lanes, argmin over the K (sublane) axis ----
        ce = jnp.dot(cb, e, preferred_element_type=jnp.float32)       # (K, T)
        e_sq = jnp.sum(e * e, axis=0, keepdims=True)                  # (1, T)
        d2 = c_sq - 2.0 * ce + e_sq                                   # (K, T)
        kio = jax.lax.broadcasted_iota(jnp.int32, d2.shape, 0).astype(jnp.float32)
        min_d = jnp.min(d2, axis=0, keepdims=True)                    # (1, T)
        cand = jnp.where(d2 <= min_d, kio, float(K))                  # ties -> smallest idx
        idx = jnp.min(cand, axis=0, keepdims=True)                    # (1, T)
        onehot = (kio == idx).astype(jnp.float32)                     # (K, T)
        q = jnp.dot(cbt, onehot, preferred_element_type=jnp.float32)  # (D, T)
        pen_a += jnp.mean((q - e) ** 2)                               # commitment penalty
        # TODO(synk): straight-through estimator for VQ gradients not implemented (fwd only)

        # ---- decoder (1x1 conv D->C) fused with de-normalization ----
        y = jnp.dot(wd, q, preferred_element_type=jnp.float32) + bd   # (C, T)
        p = y * std + mean
        dec_ref[b] = p

        # ---- NeuralLoss (reference works on the (B,T,C) transpose; same values here) ----
        t = x

        # mse
        mse_a += jnp.mean((p - t) ** 2)

        # correlation over channels per time step
        pc = p - jnp.mean(p, axis=0, keepdims=True)
        tc = t - jnp.mean(t, axis=0, keepdims=True)
        pv = jnp.maximum(jnp.sum(pc * pc, axis=0, keepdims=True), EPS)
        tv = jnp.maximum(jnp.sum(tc * tc, axis=0, keepdims=True), EPS)
        cors = jnp.sum(pc * tc, axis=0, keepdims=True) / (jnp.sqrt(pv * tv) + EPS)
        cors = jnp.clip(cors, -1.0 + EPS, 1.0 - EPS)
        corr_a += jnp.mean(1.0 - cors)

        # temporal coherence: diff along dim 2 of the transposed (B,T,C) tensor = channels
        pd = p[1:, :] - p[:-1, :]
        td = t[1:, :] - t[:-1, :]
        temp_a += jnp.mean((pd - td) ** 2)

        # SSIM: zero-padded depthwise gaussian conv1d as Toeplitz matmuls on the MXU
        mu1 = jnp.dot(p, G, preferred_element_type=jnp.float32)
        mu2 = jnp.dot(t, G, preferred_element_type=jnp.float32)
        mu1_sq = mu1 * mu1
        mu2_sq = mu2 * mu2
        mu1mu2 = mu1 * mu2
        s1 = jnp.dot(p * p, G, preferred_element_type=jnp.float32) - mu1_sq
        s2 = jnp.dot(t * t, G, preferred_element_type=jnp.float32) - mu2_sq
        s12 = jnp.dot(p * t, G, preferred_element_type=jnp.float32) - mu1mu2
        ssim_map = ((2.0 * mu1mu2 + c1) * (2.0 * s12 + c2)) / \
                   ((mu1_sq + mu2_sq + c1) * (s1 + s2 + c2))
        ssim_a += jnp.mean(1.0 - ssim_map)

        # discriminator (time-mean pooling + linear C->1) + stable BCE-with-logits
        logit_real = jnp.sum(wdc * jnp.mean(r, axis=1, keepdims=True)) + bdc
        logit_fake = jnp.sum(wdc * jnp.mean(p, axis=1, keepdims=True)) + bdc
        adv_a += softplus(-logit_real) + softplus(logit_fake)   # BCE vs 1 + BCE vs 0

    # batch means + weighted total, all in-kernel (no downstream XLA reductions)
    inv_b = 1.0 / B
    mse_m = mse_a * inv_b
    corr_m = corr_a * inv_b
    temp_m = temp_a * inv_b
    ssim_m = ssim_a * inv_b
    adv_m = adv_a * inv_b
    pen_m = pen_a * inv_b
    loss_rec = 0.1 * mse_m + 0.1 * corr_m + 0.1 * temp_m + 0.35 * ssim_m + 0.35 * adv_m
    total = loss_rec + pen_m

    lio = jax.lax.broadcasted_iota(jnp.int32, (1, NLANES), 1)
    row = (jnp.where(lio == L_MSE, mse_m, 0.0)
           + jnp.where(lio == L_CORR, corr_m, 0.0)
           + jnp.where(lio == L_TEMP, temp_m, 0.0)
           + jnp.where(lio == L_SSIM, ssim_m, 0.0)
           + jnp.where(lio == L_ADV, adv_m, 0.0)
           + jnp.where(lio == L_PEN, pen_m, 0.0)
           + jnp.where(lio == L_REC, loss_rec, 0.0)
           + jnp.where(lio == L_TOT, total, 0.0))
    loss_ref[...] = row


# ----------------------------------------------------------------------------
# Single grid-less pallas_call wrapper
# ----------------------------------------------------------------------------
def neural_encodec_forward(x, real_signal, params):
    (w1, b1, w2, b2, codebook, wd, bd, wdisc, bdisc) = params
    codebook_t = codebook.T        # (D, K): kernel never transposes
    wdisc_t = wdisc.T              # (C, 1)

    vmem = pl.BlockSpec(memory_space=pltpu.MemorySpace.VMEM)

    decoded, emb, stats, loss_row = pl.pallas_call(
        encodec_fused_kernel,
        out_shape=(jax.ShapeDtypeStruct((B, C, T), jnp.float32),
                   jax.ShapeDtypeStruct((B, D, T), jnp.float32),
                   jax.ShapeDtypeStruct((B, C, 2), jnp.float32),
                   jax.ShapeDtypeStruct((1, NLANES), jnp.float32)),
        in_specs=[vmem] * 13,
        out_specs=(vmem, vmem, vmem, vmem),
    )(x, real_signal, w1, b1, w2, b2, codebook, codebook_t,
      wd, bd, wdisc_t, bdisc, GAUSS_MAT)

    # decoded.shape[2] == x.shape[2] by construction (stride-1 codec), so the
    # F.interpolate branch of the reference forward is never taken.
    # TODO(synk): linear-interpolation resize path not implemented (unreachable here).

    mse = loss_row[0, L_MSE]
    corr = loss_row[0, L_CORR]
    temporal = loss_row[0, L_TEMP]
    ssim = loss_row[0, L_SSIM]
    adv_loss = loss_row[0, L_ADV]
    loss_rec = loss_row[0, L_REC]
    total_loss = loss_row[0, L_TOT]

    loss_components = {
        # matches the reference: criterion's total (no VQ penalty) is what gets logged
        'total_loss': loss_rec,
        'mse': mse,
        'corr': corr,
        'temporal': temporal,
        'ssim': ssim,
        'adv_loss': adv_loss,
    }
    return decoded, total_loss, loss_components, (emb, stats)


# ----------------------------------------------------------------------------
# Main
# ----------------------------------------------------------------------------
if __name__ == "__main__":
    key = jax.random.PRNGKey(0)
    ks = jax.random.split(key, 12)

    x = jax.random.normal(ks[0], (B, C, T), jnp.float32)
    real_signal = jax.random.normal(ks[1], (B, C, T), jnp.float32)

    # deterministic synthetic parameters
    w1 = 0.2 * jax.random.normal(ks[2], (H, C), jnp.float32)
    b1 = 0.1 * jax.random.normal(ks[3], (H, 1), jnp.float32)
    w2 = 0.2 * jax.random.normal(ks[4], (D, H), jnp.float32)
    b2 = 0.1 * jax.random.normal(ks[5], (D, 1), jnp.float32)
    codebook = 0.5 * jax.random.normal(ks[6], (K, D), jnp.float32)
    wd = 0.2 * jax.random.normal(ks[7], (C, D), jnp.float32)
    bd = 0.1 * jax.random.normal(ks[8], (C, 1), jnp.float32)
    wdisc = 0.3 * jax.random.normal(ks[9], (1, C), jnp.float32)
    bdisc = 0.1 * jax.random.normal(ks[10], (1, 1), jnp.float32)

    params = (w1, b1, w2, b2, codebook, wd, bd, wdisc, bdisc)

    fwd = jax.jit(neural_encodec_forward)
    decoded, total_loss, comps, (emb, scale) = fwd(x, real_signal, params)
    jax.block_until_ready((decoded, total_loss, comps, emb, scale))

    assert decoded.shape == (B, C, T)
    assert emb.shape == (B, D, T)
    assert scale.shape == (B, C, 2)
    assert bool(jnp.isfinite(total_loss))
    assert all(bool(jnp.isfinite(v)) for v in comps.values())

    print("KERNEL_OK")
</pallas_src>

<mosaic_0001>
module attributes {stable_mosaic.version = 11 : i64} {
  func.func @encodec_fused_kernel(%arg0: memref<2x4x16xf32, #tpu.memory_space<vmem>>, %arg1: memref<2x4x16xf32, #tpu.memory_space<vmem>>, %arg2: memref<16x4xf32, #tpu.memory_space<vmem>>, %arg3: memref<16x1xf32, #tpu.memory_space<vmem>>, %arg4: memref<8x16xf32, #tpu.memory_space<vmem>>, %arg5: memref<8x1xf32, #tpu.memory_space<vmem>>, %arg6: memref<16x8xf32, #tpu.memory_space<vmem>>, %arg7: memref<8x16xf32, #tpu.memory_space<vmem>>, %arg8: memref<4x8xf32, #tpu.memory_space<vmem>>, %arg9: memref<4x1xf32, #tpu.memory_space<vmem>>, %arg10: memref<4x1xf32, #tpu.memory_space<vmem>>, %arg11: memref<1x1xf32, #tpu.memory_space<vmem>>, %arg12: memref<16x16xf32, #tpu.memory_space<vmem>>, %arg13: memref<2x4x16xf32, #tpu.memory_space<vmem>>, %arg14: memref<2x8x16xf32, #tpu.memory_space<vmem>>, %arg15: memref<2x4x2xf32, #tpu.memory_space<vmem>>, %arg16: memref<1x128xf32, #tpu.memory_space<vmem>>) attributes {dimension_semantics = [], scalar_prefetch = 0 : i64, scratch_operands = 0 : i64, tpu.core_type = #tpu.core_type<tc>} {
    %c0 = arith.constant 0 : index
    %c0_0 = arith.constant 0 : index
    %0 = vector.load %arg2[%c0, %c0_0] : memref<16x4xf32, #tpu.memory_space<vmem>>, vector<16x4xf32>
    %c0_1 = arith.constant 0 : index
    %c0_2 = arith.constant 0 : index
    %1 = vector.load %arg3[%c0_1, %c0_2] : memref<16x1xf32, #tpu.memory_space<vmem>>, vector<16x1xf32>
    %c0_3 = arith.constant 0 : index
    %c0_4 = arith.constant 0 : index
    %2 = vector.load %arg4[%c0_3, %c0_4] : memref<8x16xf32, #tpu.memory_space<vmem>>, vector<8x16xf32>
    %c0_5 = arith.constant 0 : index
    %c0_6 = arith.constant 0 : index
    %3 = vector.load %arg5[%c0_5, %c0_6] : memref<8x1xf32, #tpu.memory_space<vmem>>, vector<8x1xf32>
    %c0_7 = arith.constant 0 : index
    %c0_8 = arith.constant 0 : index
    %4 = vector.load %arg6[%c0_7, %c0_8] : memref<16x8xf32, #tpu.memory_space<vmem>>, vector<16x8xf32>
    %c0_9 = arith.constant 0 : index
    %c0_10 = arith.constant 0 : index
    %5 = vector.load %arg7[%c0_9, %c0_10] : memref<8x16xf32, #tpu.memory_space<vmem>>, vector<8x16xf32>
    %c0_11 = arith.constant 0 : index
    %c0_12 = arith.constant 0 : index
    %6 = vector.load %arg8[%c0_11, %c0_12] : memref<4x8xf32, #tpu.memory_space<vmem>>, vector<4x8xf32>
    %c0_13 = arith.constant 0 : index
    %c0_14 = arith.constant 0 : index
    %7 = vector.load %arg9[%c0_13, %c0_14] : memref<4x1xf32, #tpu.memory_space<vmem>>, vector<4x1xf32>
    %c0_15 = arith.constant 0 : index
    %c0_16 = arith.constant 0 : index
    %8 = vector.load %arg10[%c0_15, %c0_16] : memref<4x1xf32, #tpu.memory_space<vmem>>, vector<4x1xf32>
    %c0_17 = arith.constant 0 : index
    %c0_18 = arith.constant 0 : index
    %9 = vector.load %arg11[%c0_17, %c0_18] : memref<1x1xf32, #tpu.memory_space<vmem>>, vector<1x1xf32>
    %10 = vector.extract %9[0, 0] : f32 from vector<1x1xf32>
    %c0_19 = arith.constant 0 : index
    %c0_20 = arith.constant 0 : index
    %11 = vector.load %arg12[%c0_19, %c0_20] : memref<16x16xf32, #tpu.memory_space<vmem>>, vector<16x16xf32>
    %12 = arith.mulf %4, %4 : vector<16x8xf32>
    %cst = arith.constant dense<0.000000e+00> : vector<16xf32>
    %13 = vector.multi_reduction <add>, %12, %cst [1] : vector<16x8xf32> to vector<16xf32>
    %14 = vector.shape_cast %13 : vector<16xf32> to vector<16x1xf32>
    %c0_21 = arith.constant 0 : index
    %c0_22 = arith.constant 0 : index
    %c0_23 = arith.constant 0 : index
    %15 = vector.load %arg0[%c0_21, %c0_22, %c0_23] : memref<2x4x16xf32, #tpu.memory_space<vmem>>, vector<1x4x16xf32>
    %16 = vector.shape_cast %15 : vector<1x4x16xf32> to vector<4x16xf32>
    %c0_24 = arith.constant 0 : index
    %c0_25 = arith.constant 0 : index
    %c0_26 = arith.constant 0 : index
    %17 = vector.load %arg1[%c0_24, %c0_25, %c0_26] : memref<2x4x16xf32, #tpu.memory_space<vmem>>, vector<1x4x16xf32>
    %18 = vector.shape_cast %17 : vector<1x4x16xf32> to vector<4x16xf32>
    %cst_27 = arith.constant dense<0.000000e+00> : vector<4xf32>
    %19 = vector.multi_reduction <add>, %16, %cst_27 [1] : vector<4x16xf32> to vector<4xf32>
    %20 = vector.shape_cast %19 : vector<4xf32> to vector<4x1xf32>
    %cst_28 = arith.constant 1.600000e+01 : f32
    %21 = vector.broadcast %cst_28 : f32 to vector<4x1xf32>
    %22 = arith.divf %20, %21 : vector<4x1xf32>
    %23 = vector.broadcast %22 : vector<4x1xf32> to vector<4x16xf32>
    %24 = arith.subf %16, %23 : vector<4x16xf32>
    %25 = arith.mulf %24, %24 : vector<4x16xf32>
    %cst_29 = arith.constant dense<0.000000e+00> : vector<4xf32>
    %26 = vector.multi_reduction <add>, %25, %cst_29 [1] : vector<4x16xf32> to vector<4xf32>
    %27 = vector.shape_cast %26 : vector<4xf32> to vector<4x1xf32>
    %cst_30 = arith.constant 1.500000e+01 : f32
    %28 = vector.broadcast %cst_30 : f32 to vector<4x1xf32>
    %29 = arith.divf %27, %28 : vector<4x1xf32>
    %30 = math.sqrt %29 : vector<4x1xf32>
    %31 = vector.broadcast %22 : vector<4x1xf32> to vector<4x16xf32>
    %32 = arith.subf %16, %31 : vector<4x16xf32>
    %cst_31 = arith.constant 9.99999993E-9 : f32
    %33 = vector.broadcast %cst_31 : f32 to vector<4x1xf32>
    %34 = arith.addf %30, %33 : vector<4x1xf32>
    %35 = vector.broadcast %34 : vector<4x1xf32> to vector<4x16xf32>
    %36 = arith.divf %32, %35 : vector<4x16xf32>
    %37 = tpu.iota {dimensions = array<i32: 1>} : vector<4x2xi32>
    %c0_i32 = arith.constant 0 : i32
    %38 = vector.broadcast %c0_i32 : i32 to vector<4x2xi32>
    %39 = arith.cmpi eq, %37, %38 : vector<4x2xi32>
    %40 = vector.shape_cast %22 : vector<4x1xf32> to vector<4x1xf32>
    %41 = vector.broadcast %40 : vector<4x1xf32> to vector<4x2xf32>
    %42 = vector.shape_cast %30 : vector<4x1xf32> to vector<4x1xf32>
    %43 = vector.broadcast %42 : vector<4x1xf32> to vector<4x2xf32>
    %44 = arith.select %39, %41, %43 : vector<4x2xi1>, vector<4x2xf32>
    %c0_32 = arith.constant 0 : index
    %c0_33 = arith.constant 0 : index
    %c0_34 = arith.constant 0 : index
    %45 = vector.load %arg15[%c0_32, %c0_33, %c0_34] : memref<2x4x2xf32, #tpu.memory_space<vmem>>, vector<1x4x2xf32>
    %46 = vector.shape_cast %45 : vector<1x4x2xf32> to vector<4x2xf32>
    %47 = vector.shape_cast %44 : vector<4x2xf32> to vector<1x4x2xf32>
    tpu.vector_store %arg15[%c0_32, %c0_33, %c0_34], %47 {strides = array<i32>} : memref<2x4x2xf32, #tpu.memory_space<vmem>>, vector<1x4x2xf32>,
    %cst_35 = arith.constant dense<0.000000e+00> : vector<16x16xf32>
    %48 = tpu.matmul %0, %36, %cst_35 {dimension_numbers = #tpu.dot_dimension_numbers<[1], [0], [0], [1], [0, 0, 1, 1], [], []>} : vector<16x4xf32>, vector<4x16xf32>, vector<16x16xf32> -> vector<16x16xf32>
    %49 = vector.broadcast %1 : vector<16x1xf32> to vector<16x16xf32>
    %50 = arith.addf %48, %49 : vector<16x16xf32>
    %cst_36 = arith.constant 0.000000e+00 : f32
    %51 = vector.broadcast %cst_36 : f32 to vector<16x16xf32>
    %52 = arith.maximumf %50, %51 : vector<16x16xf32>
    %cst_37 = arith.constant dense<0.000000e+00> : vector<8x16xf32>
    %53 = tpu.matmul %2, %52, %cst_37 {dimension_numbers = #tpu.dot_dimension_numbers<[1], [0], [0], [1], [0, 0, 1, 1], [], []>} : vector<8x16xf32>, vector<16x16xf32>, vector<8x16xf32> -> vector<8x16xf32>
    %54 = vector.broadcast %3 : vector<8x1xf32> to vector<8x16xf32>
    %55 = arith.addf %53, %54 : vector<8x16xf32>
    %c0_38 = arith.constant 0 : index
    %c0_39 = arith.constant 0 : index
    %c0_40 = arith.constant 0 : index
    %56 = vector.load %arg14[%c0_38, %c0_39, %c0_40] : memref<2x8x16xf32, #tpu.memory_space<vmem>>, vector<1x8x16xf32>
    %57 = vector.shape_cast %56 : vector<1x8x16xf32> to vector<8x16xf32>
    %58 = vector.shape_cast %55 : vector<8x16xf32> to vector<1x8x16xf32>
    tpu.vector_store %arg14[%c0_38, %c0_39, %c0_40], %58 {strides = array<i32>} : memref<2x8x16xf32, #tpu.memory_space<vmem>>, vector<1x8x16xf32>,
    %cst_41 = arith.constant dense<0.000000e+00> : vector<16x16xf32>
    %59 = tpu.matmul %4, %55, %cst_41 {dimension_numbers = #tpu.dot_dimension_numbers<[1], [0], [0], [1], [0, 0, 1, 1], [], []>} : vector<16x8xf32>, vector<8x16xf32>, vector<16x16xf32> -> vector<16x16xf32>
    %60 = arith.mulf %55, %55 : vector<8x16xf32>
    %cst_42 = arith.constant dense<0.000000e+00> : vector<16xf32>
    %61 = vector.multi_reduction <add>, %60, %cst_42 [0] : vector<8x16xf32> to vector<16xf32>
    %62 = vector.shape_cast %61 : vector<16xf32> to vector<1x16xf32>
    %cst_43 = arith.constant 2.000000e+00 : f32
    %63 = vector.broadcast %cst_43 : f32 to vector<16x16xf32>
    %64 = arith.mulf %63, %59 : vector<16x16xf32>
    %65 = vector.broadcast %14 : vector<16x1xf32> to vector<16x16xf32>
    %66 = arith.subf %65, %64 : vector<16x16xf32>
    %67 = vector.broadcast %62 : vector<1x16xf32> to vector<16x16xf32>
    %68 = arith.addf %66, %67 : vector<16x16xf32>
    %69 = tpu.iota {dimensions = array<i32: 0>} : vector<16x16xi32>
    %70 = arith.sitofp %69 : vector<16x16xi32> to vector<16x16xf32>
    %cst_44 = arith.constant dense<0x7F800000> : vector<16xf32>
    %71 = vector.multi_reduction <minimumf>, %68, %cst_44 [0] : vector<16x16xf32> to vector<16xf32>
    %72 = vector.shape_cast %71 : vector<16xf32> to vector<1x16xf32>
    %73 = vector.broadcast %72 : vector<1x16xf32> to vector<16x16xf32>
    %74 = arith.cmpf ole, %68, %73 : vector<16x16xf32>
    %cst_45 = arith.constant 1.600000e+01 : f32
    %75 = vector.broadcast %cst_45 : f32 to vector<16x16xf32>
    %76 = arith.select %74, %70, %75 : vector<16x16xi1>, vector<16x16xf32>
    %cst_46 = arith.constant dense<0x7F800000> : vector<16xf32>
    %77 = vector.multi_reduction <minimumf>, %76, %cst_46 [0] : vector<16x16xf32> to vector<16xf32>
    %78 = vector.shape_cast %77 : vector<16xf32> to vector<1x16xf32>
    %79 = vector.broadcast %78 : vector<1x16xf32> to vector<16x16xf32>
    %80 = arith.cmpf oeq, %70, %79 : vector<16x16xf32>
    %81 = arith.extui %80 : vector<16x16xi1> to vector<16x16xi32>
    %82 = arith.sitofp %81 : vector<16x16xi32> to vector<16x16xf32>
    %cst_47 = arith.constant dense<0.000000e+00> : vector<8x16xf32>
    %83 = tpu.matmul %5, %82, %cst_47 {dimension_numbers = #tpu.dot_dimension_numbers<[1], [0], [0], [1], [0, 0, 1, 1], [], []>} : vector<8x16xf32>, vector<16x16xf32>, vector<8x16xf32> -> vector<8x16xf32>
    %84 = arith.subf %83, %55 : vector<8x16xf32>
    %85 = arith.mulf %84, %84 : vector<8x16xf32>
    %86 = vector.shape_cast %85 : vector<8x16xf32> to vector<1x8x16xf32>
    %cst_48 = arith.constant dense<0.000000e+00> : vector<1xf32>
    %87 = vector.multi_reduction <add>, %86, %cst_48 [1, 2] : vector<1x8x16xf32> to vector<1xf32>
    %88 = vector.shape_cast %87 : vector<1xf32> to vector<1x1x1xf32>
    %89 = vector.extract %88[0, 0, 0] : f32 from vector<1x1x1xf32>
    %cst_49 = arith.constant 1.280000e+02 : f32
    %90 = arith.divf %89, %cst_49 : f32
    %cst_50 = arith.constant 0.000000e+00 : f32
    %91 = arith.addf %cst_50, %90 : f32
    %cst_51 = arith.constant dense<0.000000e+00> : vector<4x16xf32>
    %92 = tpu.matmul %6, %83, %cst_51 {dimension_numbers = #tpu.dot_dimension_numbers<[1], [0], [0], [1], [0, 0, 1, 1], [], []>} : vector<4x8xf32>, vector<8x16xf32>, vector<4x16xf32> -> vector<4x16xf32>
    %93 = vector.broadcast %7 : vector<4x1xf32> to vector<4x16xf32>
    %94 = arith.addf %92, %93 : vector<4x16xf32>
    %95 = vector.broadcast %30 : vector<4x1xf32> to vector<4x16xf32>
    %96 = arith.mulf %94, %95 : vector<4x16xf32>
    %97 = vector.broadcast %22 : vector<4x1xf32> to vector<4x16xf32>
    %98 = arith.addf %96, %97 : vector<4x16xf32>
    %c0_52 = arith.constant 0 : index
    %c0_53 = arith.constant 0 : index
    %c0_54 = arith.constant 0 : index
    %99 = vector.load %arg13[%c0_52, %c0_53, %c0_54] : memref<2x4x16xf32, #tpu.memory_space<vmem>>, vector<1x4x16xf32>
    %100 = vector.shape_cast %99 : vector<1x4x16xf32> to vector<4x16xf32>
    %101 = vector.shape_cast %98 : vector<4x16xf32> to vector<1x4x16xf32>
    tpu.vector_store %arg13[%c0_52, %c0_53, %c0_54], %101 {strides = array<i32>} : memref<2x4x16xf32, #tpu.memory_space<vmem>>, vector<1x4x16xf32>,
    %102 = arith.subf %98, %16 : vector<4x16xf32>
    %103 = arith.mulf %102, %102 : vector<4x16xf32>
    %104 = vector.shape_cast %103 : vector<4x16xf32> to vector<1x4x16xf32>
    %cst_55 = arith.constant dense<0.000000e+00> : vector<1xf32>
    %105 = vector.multi_reduction <add>, %104, %cst_55 [1, 2] : vector<1x4x16xf32> to vector<1xf32>
    %106 = vector.shape_cast %105 : vector<1xf32> to vector<1x1x1xf32>
    %107 = vector.extract %106[0, 0, 0] : f32 from vector<1x1x1xf32>
    %cst_56 = arith.constant 6.400000e+01 : f32
    %108 = arith.divf %107, %cst_56 : f32
    %cst_57 = arith.constant 0.000000e+00 : f32
    %109 = arith.addf %cst_57, %108 : f32
    %cst_58 = arith.constant dense<0.000000e+00> : vector<16xf32>
    %110 = vector.multi_reduction <add>, %98, %cst_58 [0] : vector<4x16xf32> to vector<16xf32>
    %111 = vector.shape_cast %110 : vector<16xf32> to vector<1x16xf32>
    %cst_59 = arith.constant 4.000000e+00 : f32
    %112 = vector.broadcast %cst_59 : f32 to vector<1x16xf32>
    %113 = arith.divf %111, %112 : vector<1x16xf32>
    %114 = vector.broadcast %113 : vector<1x16xf32> to vector<4x16xf32>
    %115 = arith.subf %98, %114 : vector<4x16xf32>
    %cst_60 = arith.constant dense<0.000000e+00> : vector<16xf32>
    %116 = vector.multi_reduction <add>, %16, %cst_60 [0] : vector<4x16xf32> to vector<16xf32>
    %117 = vector.shape_cast %116 : vector<16xf32> to vector<1x16xf32>
    %cst_61 = arith.constant 4.000000e+00 : f32
    %118 = vector.broadcast %cst_61 : f32 to vector<1x16xf32>
    %119 = arith.divf %117, %118 : vector<1x16xf32>
    %120 = vector.broadcast %119 : vector<1x16xf32> to vector<4x16xf32>
    %121 = arith.subf %16, %120 : vector<4x16xf32>
    %122 = arith.mulf %115, %115 : vector<4x16xf32>
    %cst_62 = arith.constant dense<0.000000e+00> : vector<16xf32>
    %123 = vector.multi_reduction <add>, %122, %cst_62 [0] : vector<4x16xf32> to vector<16xf32>
    %124 = vector.shape_cast %123 : vector<16xf32> to vector<1x16xf32>
    %cst_63 = arith.constant 9.99999993E-9 : f32
    %125 = vector.broadcast %cst_63 : f32 to vector<1x16xf32>
    %126 = arith.maximumf %124, %125 : vector<1x16xf32>
    %127 = arith.mulf %121, %121 : vector<4x16xf32>
    %cst_64 = arith.constant dense<0.000000e+00> : vector<16xf32>
    %128 = vector.multi_reduction <add>, %127, %cst_64 [0] : vector<4x16xf32> to vector<16xf32>
    %129 = vector.shape_cast %128 : vector<16xf32> to vector<1x16xf32>
    %cst_65 = arith.constant 9.99999993E-9 : f32
    %130 = vector.broadcast %cst_65 : f32 to vector<1x16xf32>
    %131 = arith.maximumf %129, %130 : vector<1x16xf32>
    %132 = arith.mulf %115, %121 : vector<4x16xf32>
    %cst_66 = arith.constant dense<0.000000e+00> : vector<16xf32>
    %133 = vector.multi_reduction <add>, %132, %cst_66 [0] : vector<4x16xf32> to vector<16xf32>
    %134 = vector.shape_cast %133 : vector<16xf32> to vector<1x16xf32>
    %135 = arith.mulf %126, %131 : vector<1x16xf32>
    %136 = math.sqrt %135 : vector<1x16xf32>
    %cst_67 = arith.constant 9.99999993E-9 : f32
    %137 = vector.broadcast %cst_67 : f32 to vector<1x16xf32>
    %138 = arith.addf %136, %137 : vector<1x16xf32>
    %139 = arith.divf %134, %138 : vector<1x16xf32>
    %cst_68 = arith.constant -1.000000e+00 : f32
    %cst_69 = arith.constant 1.000000e+00 : f32
    %140 = vector.broadcast %cst_68 : f32 to vector<1x16xf32>
    %141 = arith.maximumf %140, %139 : vector<1x16xf32>
    %142 = vector.broadcast %cst_69 : f32 to vector<1x16xf32>
    %143 = arith.minimumf %142, %141 : vector<1x16xf32>
    %cst_70 = arith.constant 1.000000e+00 : f32
    %144 = vector.broadcast %cst_70 : f32 to vector<1x16xf32>
    %145 = arith.subf %144, %143 : vector<1x16xf32>
    %146 = vector.shape_cast %145 : vector<1x16xf32> to vector<1x1x16xf32>
    %cst_71 = arith.constant dense<0.000000e+00> : vector<1xf32>
    %147 = vector.multi_reduction <add>, %146, %cst_71 [1, 2] : vector<1x1x16xf32> to vector<1xf32>
    %148 = vector.shape_cast %147 : vector<1xf32> to vector<1x1x1xf32>
    %149 = vector.extract %148[0, 0, 0] : f32 from vector<1x1x1xf32>
    %cst_72 = arith.constant 1.600000e+01 : f32
    %150 = arith.divf %149, %cst_72 : f32
    %cst_73 = arith.constant 0.000000e+00 : f32
    %151 = arith.addf %cst_73, %150 : f32
    %152 = vector.extract_strided_slice %98 {offsets = [1, 0], sizes = [3, 16], strides = [1, 1]} : vector<4x16xf32> to vector<3x16xf32>
    %153 = vector.extract_strided_slice %98 {offsets = [0, 0], sizes = [3, 16], strides = [1, 1]} : vector<4x16xf32> to vector<3x16xf32>
    %154 = arith.subf %152, %153 : vector<3x16xf32>
    %155 = vector.extract_strided_slice %16 {offsets = [1, 0], sizes = [3, 16], strides = [1, 1]} : vector<4x16xf32> to vector<3x16xf32>
    %156 = vector.extract_strided_slice %16 {offsets = [0, 0], sizes = [3, 16], strides = [1, 1]} : vector<4x16xf32> to vector<3x16xf32>
    %157 = arith.subf %155, %156 : vector<3x16xf32>
    %158 = arith.subf %154, %157 : vector<3x16xf32>
    %159 = arith.mulf %158, %158 : vector<3x16xf32>
    %160 = vector.shape_cast %159 : vector<3x16xf32> to vector<1x3x16xf32>
    %cst_74 = arith.constant dense<0.000000e+00> : vector<1xf32>
    %161 = vector.multi_reduction <add>, %160, %cst_74 [1, 2] : vector<1x3x16xf32> to vector<1xf32>
    %162 = vector.shape_cast %161 : vector<1xf32> to vector<1x1x1xf32>
    %163 = vector.extract %162[0, 0, 0] : f32 from vector<1x1x1xf32>
    %cst_75 = arith.constant 4.800000e+01 : f32
    %164 = arith.divf %163, %cst_75 : f32
    %cst_76 = arith.constant 0.000000e+00 : f32
    %165 = arith.addf %cst_76, %164 : f32
    %cst_77 = arith.constant dense<0.000000e+00> : vector<4x16xf32>
    %166 = tpu.matmul %98, %11, %cst_77 {dimension_numbers = #tpu.dot_dimension_numbers<[1], [0], [0], [1], [0, 0, 1, 1], [], []>} : vector<4x16xf32>, vector<16x16xf32>, vector<4x16xf32> -> vector<4x16xf32>
    %cst_78 = arith.constant dense<0.000000e+00> : vector<4x16xf32>
    %167 = tpu.matmul %16, %11, %cst_78 {dimension_numbers = #tpu.dot_dimension_numbers<[1], [0], [0], [1], [0, 0, 1, 1], [], []>} : vector<4x16xf32>, vector<16x16xf32>, vector<4x16xf32> -> vector<4x16xf32>
    %168 = arith.mulf %166, %166 : vector<4x16xf32>
    %169 = arith.mulf %167, %167 : vector<4x16xf32>
    %170 = arith.mulf %166, %167 : vector<4x16xf32>
    %171 = arith.mulf %98, %98 : vector<4x16xf32>
    %cst_79 = arith.constant dense<0.000000e+00> : vector<4x16xf32>
    %172 = tpu.matmul %171, %11, %cst_79 {dimension_numbers = #tpu.dot_dimension_numbers<[1], [0], [0], [1], [0, 0, 1, 1], [], []>} : vector<4x16xf32>, vector<16x16xf32>, vector<4x16xf32> -> vector<4x16xf32>
    %173 = arith.subf %172, %168 : vector<4x16xf32>
    %174 = arith.mulf %16, %16 : vector<4x16xf32>
    %cst_80 = arith.constant dense<0.000000e+00> : vector<4x16xf32>
    %175 = tpu.matmul %174, %11, %cst_80 {dimension_numbers = #tpu.dot_dimension_numbers<[1], [0], [0], [1], [0, 0, 1, 1], [], []>} : vector<4x16xf32>, vector<16x16xf32>, vector<4x16xf32> -> vector<4x16xf32>
    %176 = arith.subf %175, %169 : vector<4x16xf32>
    %177 = arith.mulf %98, %16 : vector<4x16xf32>
    %cst_81 = arith.constant dense<0.000000e+00> : vector<4x16xf32>
    %178 = tpu.matmul %177, %11, %cst_81 {dimension_numbers = #tpu.dot_dimension_numbers<[1], [0], [0], [1], [0, 0, 1, 1], [], []>} : vector<4x16xf32>, vector<16x16xf32>, vector<4x16xf32> -> vector<4x16xf32>
    %179 = arith.subf %178, %170 : vector<4x16xf32>
    %cst_82 = arith.constant 2.000000e+00 : f32
    %180 = vector.broadcast %cst_82 : f32 to vector<4x16xf32>
    %181 = arith.mulf %180, %170 : vector<4x16xf32>
    %cst_83 = arith.constant 9.99999974E-5 : f32
    %182 = vector.broadcast %cst_83 : f32 to vector<4x16xf32>
    %183 = arith.addf %181, %182 : vector<4x16xf32>
    %cst_84 = arith.constant 2.000000e+00 : f32
    %184 = vector.broadcast %cst_84 : f32 to vector<4x16xf32>
    %185 = arith.mulf %184, %179 : vector<4x16xf32>
    %cst_85 = arith.constant 8.99999984E-4 : f32
    %186 = vector.broadcast %cst_85 : f32 to vector<4x16xf32>
    %187 = arith.addf %185, %186 : vector<4x16xf32>
    %188 = arith.mulf %183, %187 : vector<4x16xf32>
    %189 = arith.addf %168, %169 : vector<4x16xf32>
    %cst_86 = arith.constant 9.99999974E-5 : f32
    %190 = vector.broadcast %cst_86 : f32 to vector<4x16xf32>
    %191 = arith.addf %189, %190 : vector<4x16xf32>
    %192 = arith.addf %173, %176 : vector<4x16xf32>
    %cst_87 = arith.constant 8.99999984E-4 : f32
    %193 = vector.broadcast %cst_87 : f32 to vector<4x16xf32>
    %194 = arith.addf %192, %193 : vector<4x16xf32>
    %195 = arith.mulf %191, %194 : vector<4x16xf32>
    %196 = arith.divf %188, %195 : vector<4x16xf32>
    %cst_88 = arith.constant 1.000000e+00 : f32
    %197 = vector.broadcast %cst_88 : f32 to vector<4x16xf32>
    %198 = arith.subf %197, %196 : vector<4x16xf32>
    %199 = vector.shape_cast %198 : vector<4x16xf32> to vector<1x4x16xf32>
    %cst_89 = arith.constant dense<0.000000e+00> : vector<1xf32>
    %200 = vector.multi_reduction <add>, %199, %cst_89 [1, 2] : vector<1x4x16xf32> to vector<1xf32>
    %201 = vector.shape_cast %200 : vector<1xf32> to vector<1x1x1xf32>
    %202 = vector.extract %201[0, 0, 0] : f32 from vector<1x1x1xf32>
    %cst_90 = arith.constant 6.400000e+01 : f32
    %203 = arith.divf %202, %cst_90 : f32
    %cst_91 = arith.constant 0.000000e+00 : f32
    %204 = arith.addf %cst_91, %203 : f32
    %cst_92 = arith.constant dense<0.000000e+00> : vector<4xf32>
    %205 = vector.multi_reduction <add>, %18, %cst_92 [1] : vector<4x16xf32> to vector<4xf32>
    %206 = vector.shape_cast %205 : vector<4xf32> to vector<4x1xf32>
    %cst_93 = arith.constant 1.600000e+01 : f32
    %207 = vector.broadcast %cst_93 : f32 to vector<4x1xf32>
    %208 = arith.divf %206, %207 : vector<4x1xf32>
    %209 = arith.mulf %8, %208 : vector<4x1xf32>
    %210 = vector.shape_cast %209 : vector<4x1xf32> to vector<1x4x1xf32>
    %cst_94 = arith.constant dense<0.000000e+00> : vector<1xf32>
    %211 = vector.multi_reduction <add>, %210, %cst_94 [1, 2] : vector<1x4x1xf32> to vector<1xf32>
    %212 = vector.shape_cast %211 : vector<1xf32> to vector<1x1x1xf32>
    %213 = vector.extract %212[0, 0, 0] : f32 from vector<1x1x1xf32>
    %214 = arith.addf %213, %10 : f32
    %cst_95 = arith.constant dense<0.000000e+00> : vector<4xf32>
    %215 = vector.multi_reduction <add>, %98, %cst_95 [1] : vector<4x16xf32> to vector<4xf32>
    %216 = vector.shape_cast %215 : vector<4xf32> to vector<4x1xf32>
    %cst_96 = arith.constant 1.600000e+01 : f32
    %217 = vector.broadcast %cst_96 : f32 to vector<4x1xf32>
    %218 = arith.divf %216, %217 : vector<4x1xf32>
    %219 = arith.mulf %8, %218 : vector<4x1xf32>
    %220 = vector.shape_cast %219 : vector<4x1xf32> to vector<1x4x1xf32>
    %cst_97 = arith.constant dense<0.000000e+00> : vector<1xf32>
    %221 = vector.multi_reduction <add>, %220, %cst_97 [1, 2] : vector<1x4x1xf32> to vector<1xf32>
    %222 = vector.shape_cast %221 : vector<1xf32> to vector<1x1x1xf32>
    %223 = vector.extract %222[0, 0, 0] : f32 from vector<1x1x1xf32>
    %224 = arith.addf %223, %10 : f32
    %cst_98 = arith.constant 0.000000e+00 : f32
    %225 = arith.subf %cst_98, %214 : f32
    %cst_99 = arith.constant 0.000000e+00 : f32
    %226 = arith.maximumf %225, %cst_99 : f32
    %227 = math.absf %225 : f32
    %cst_100 = arith.constant 0.000000e+00 : f32
    %228 = arith.subf %cst_100, %227 : f32
    %229 = math.exp %228 : f32
    %cst_101 = arith.constant 1.000000e+00 : f32
    %230 = arith.addf %cst_101, %229 : f32
    %231 = math.log %230 : f32
    %232 = arith.addf %226, %231 : f32
    %cst_102 = arith.constant 0.000000e+00 : f32
    %233 = arith.maximumf %224, %cst_102 : f32
    %234 = math.absf %224 : f32
    %cst_103 = arith.constant 0.000000e+00 : f32
    %235 = arith.subf %cst_103, %234 : f32
    %236 = math.exp %235 : f32
    %cst_104 = arith.constant 1.000000e+00 : f32
    %237 = arith.addf %cst_104, %236 : f32
    %238 = math.log %237 : f32
    %239 = arith.addf %233, %238 : f32
    %240 = arith.addf %232, %239 : f32
    %cst_105 = arith.constant 0.000000e+00 : f32
    %241 = arith.addf %cst_105, %240 : f32
    %c1 = arith.constant 1 : index
    %c0_106 = arith.constant 0 : index
    %c0_107 = arith.constant 0 : index
    %242 = vector.load %arg0[%c1, %c0_106, %c0_107] : memref<2x4x16xf32, #tpu.memory_space<vmem>>, vector<1x4x16xf32>
    %243 = vector.shape_cast %242 : vector<1x4x16xf32> to vector<4x16xf32>
    %c1_108 = arith.constant 1 : index
    %c0_109 = arith.constant 0 : index
    %c0_110 = arith.constant 0 : index
    %244 = vector.load %arg1[%c1_108, %c0_109, %c0_110] : memref<2x4x16xf32, #tpu.memory_space<vmem>>, vector<1x4x16xf32>
    %245 = vector.shape_cast %244 : vector<1x4x16xf32> to vector<4x16xf32>
    %cst_111 = arith.constant dense<0.000000e+00> : vector<4xf32>
    %246 = vector.multi_reduction <add>, %243, %cst_111 [1] : vector<4x16xf32> to vector<4xf32>
    %247 = vector.shape_cast %246 : vector<4xf32> to vector<4x1xf32>
    %cst_112 = arith.constant 1.600000e+01 : f32
    %248 = vector.broadcast %cst_112 : f32 to vector<4x1xf32>
    %249 = arith.divf %247, %248 : vector<4x1xf32>
    %250 = vector.broadcast %249 : vector<4x1xf32> to vector<4x16xf32>
    %251 = arith.subf %243, %250 : vector<4x16xf32>
    %252 = arith.mulf %251, %251 : vector<4x16xf32>
    %cst_113 = arith.constant dense<0.000000e+00> : vector<4xf32>
    %253 = vector.multi_reduction <add>, %252, %cst_113 [1] : vector<4x16xf32> to vector<4xf32>
    %254 = vector.shape_cast %253 : vector<4xf32> to vector<4x1xf32>
    %cst_114 = arith.constant 1.500000e+01 : f32
    %255 = vector.broadcast %cst_114 : f32 to vector<4x1xf32>
    %256 = arith.divf %254, %255 : vector<4x1xf32>
    %257 = math.sqrt %256 : vector<4x1xf32>
    %258 = vector.broadcast %249 : vector<4x1xf32> to vector<4x16xf32>
    %259 = arith.subf %243, %258 : vector<4x16xf32>
    %cst_115 = arith.constant 9.99999993E-9 : f32
    %260 = vector.broadcast %cst_115 : f32 to vector<4x1xf32>
    %261 = arith.addf %257, %260 : vector<4x1xf32>
    %262 = vector.broadcast %261 : vector<4x1xf32> to vector<4x16xf32>
    %263 = arith.divf %259, %262 : vector<4x16xf32>
    %264 = tpu.iota {dimensions = array<i32: 1>} : vector<4x2xi32>
    %c0_i32_116 = arith.constant 0 : i32
    %265 = vector.broadcast %c0_i32_116 : i32 to vector<4x2xi32>
    %266 = arith.cmpi eq, %264, %265 : vector<4x2xi32>
    %267 = vector.shape_cast %249 : vector<4x1xf32> to vector<4x1xf32>
    %268 = vector.broadcast %267 : vector<4x1xf32> to vector<4x2xf32>
    %269 = vector.shape_cast %257 : vector<4x1xf32> to vector<4x1xf32>
    %270 = vector.broadcast %269 : vector<4x1xf32> to vector<4x2xf32>
    %271 = arith.select %266, %268, %270 : vector<4x2xi1>, vector<4x2xf32>
    %c1_117 = arith.constant 1 : index
    %c0_118 = arith.constant 0 : index
    %c0_119 = arith.constant 0 : index
    %272 = vector.load %arg15[%c1_117, %c0_118, %c0_119] : memref<2x4x2xf32, #tpu.memory_space<vmem>>, vector<1x4x2xf32>
    %273 = vector.shape_cast %272 : vector<1x4x2xf32> to vector<4x2xf32>
    %274 = vector.shape_cast %271 : vector<4x2xf32> to vector<1x4x2xf32>
    tpu.vector_store %arg15[%c1_117, %c0_118, %c0_119], %274 {strides = array<i32>} : memref<2x4x2xf32, #tpu.memory_space<vmem>>, vector<1x4x2xf32>,
    %cst_120 = arith.constant dense<0.000000e+00> : vector<16x16xf32>
    %275 = tpu.matmul %0, %263, %cst_120 {dimension_numbers = #tpu.dot_dimension_numbers<[1], [0], [0], [1], [0, 0, 1, 1], [], []>} : vector<16x4xf32>, vector<4x16xf32>, vector<16x16xf32> -> vector<16x16xf32>
    %276 = vector.broadcast %1 : vector<16x1xf32> to vector<16x16xf32>
    %277 = arith.addf %275, %276 : vector<16x16xf32>
    %cst_121 = arith.constant 0.000000e+00 : f32
    %278 = vector.broadcast %cst_121 : f32 to vector<16x16xf32>
    %279 = arith.maximumf %277, %278 : vector<16x16xf32>
    %cst_122 = arith.constant dense<0.000000e+00> : vector<8x16xf32>
    %280 = tpu.matmul %2, %279, %cst_122 {dimension_numbers = #tpu.dot_dimension_numbers<[1], [0], [0], [1], [0, 0, 1, 1], [], []>} : vector<8x16xf32>, vector<16x16xf32>, vector<8x16xf32> -> vector<8x16xf32>
    %281 = vector.broadcast %3 : vector<8x1xf32> to vector<8x16xf32>
    %282 = arith.addf %280, %281 : vector<8x16xf32>
    %c1_123 = arith.constant 1 : index
    %c0_124 = arith.constant 0 : index
    %c0_125 = arith.constant 0 : index
    %283 = vector.load %arg14[%c1_123, %c0_124, %c0_125] : memref<2x8x16xf32, #tpu.memory_space<vmem>>, vector<1x8x16xf32>
    %284 = vector.shape_cast %283 : vector<1x8x16xf32> to vector<8x16xf32>
    %285 = vector.shape_cast %282 : vector<8x16xf32> to vector<1x8x16xf32>
    tpu.vector_store %arg14[%c1_123, %c0_124, %c0_125], %285 {strides = array<i32>} : memref<2x8x16xf32, #tpu.memory_space<vmem>>, vector<1x8x16xf32>,
    %cst_126 = arith.constant dense<0.000000e+00> : vector<16x16xf32>
    %286 = tpu.matmul %4, %282, %cst_126 {dimension_numbers = #tpu.dot_dimension_numbers<[1], [0], [0], [1], [0, 0, 1, 1], [], []>} : vector<16x8xf32>, vector<8x16xf32>, vector<16x16xf32> -> vector<16x16xf32>
    %287 = arith.mulf %282, %282 : vector<8x16xf32>
    %cst_127 = arith.constant dense<0.000000e+00> : vector<16xf32>
    %288 = vector.multi_reduction <add>, %287, %cst_127 [0] : vector<8x16xf32> to vector<16xf32>
    %289 = vector.shape_cast %288 : vector<16xf32> to vector<1x16xf32>
    %cst_128 = arith.constant 2.000000e+00 : f32
    %290 = vector.broadcast %cst_128 : f32 to vector<16x16xf32>
    %291 = arith.mulf %290, %286 : vector<16x16xf32>
    %292 = vector.broadcast %14 : vector<16x1xf32> to vector<16x16xf32>
    %293 = arith.subf %292, %291 : vector<16x16xf32>
    %294 = vector.broadcast %289 : vector<1x16xf32> to vector<16x16xf32>
    %295 = arith.addf %293, %294 : vector<16x16xf32>
    %296 = tpu.iota {dimensions = array<i32: 0>} : vector<16x16xi32>
    %297 = arith.sitofp %296 : vector<16x16xi32> to vector<16x16xf32>
    %cst_129 = arith.constant dense<0x7F800000> : vector<16xf32>
    %298 = vector.multi_reduction <minimumf>, %295, %cst_129 [0] : vector<16x16xf32> to vector<16xf32>
    %299 = vector.shape_cast %298 : vector<16xf32> to vector<1x16xf32>
    %300 = vector.broadcast %299 : vector<1x16xf32> to vector<16x16xf32>
    %301 = arith.cmpf ole, %295, %300 : vector<16x16xf32>
    %cst_130 = arith.constant 1.600000e+01 : f32
    %302 = vector.broadcast %cst_130 : f32 to vector<16x16xf32>
    %303 = arith.select %301, %297, %302 : vector<16x16xi1>, vector<16x16xf32>
    %cst_131 = arith.constant dense<0x7F800000> : vector<16xf32>
    %304 = vector.multi_reduction <minimumf>, %303, %cst_131 [0] : vector<16x16xf32> to vector<16xf32>
    %305 = vector.shape_cast %304 : vector<16xf32> to vector<1x16xf32>
    %306 = vector.broadcast %305 : vector<1x16xf32> to vector<16x16xf32>
    %307 = arith.cmpf oeq, %297, %306 : vector<16x16xf32>
    %308 = arith.extui %307 : vector<16x16xi1> to vector<16x16xi32>
    %309 = arith.sitofp %308 : vector<16x16xi32> to vector<16x16xf32>
    %cst_132 = arith.constant dense<0.000000e+00> : vector<8x16xf32>
    %310 = tpu.matmul %5, %309, %cst_132 {dimension_numbers = #tpu.dot_dimension_numbers<[1], [0], [0], [1], [0, 0, 1, 1], [], []>} : vector<8x16xf32>, vector<16x16xf32>, vector<8x16xf32> -> vector<8x16xf32>
    %311 = arith.subf %310, %282 : vector<8x16xf32>
    %312 = arith.mulf %311, %311 : vector<8x16xf32>
    %313 = vector.shape_cast %312 : vector<8x16xf32> to vector<1x8x16xf32>
    %cst_133 = arith.constant dense<0.000000e+00> : vector<1xf32>
    %314 = vector.multi_reduction <add>, %313, %cst_133 [1, 2] : vector<1x8x16xf32> to vector<1xf32>
    %315 = vector.shape_cast %314 : vector<1xf32> to vector<1x1x1xf32>
    %316 = vector.extract %315[0, 0, 0] : f32 from vector<1x1x1xf32>
    %cst_134 = arith.constant 1.280000e+02 : f32
    %317 = arith.divf %316, %cst_134 : f32
    %318 = arith.addf %91, %317 : f32
    %cst_135 = arith.constant dense<0.000000e+00> : vector<4x16xf32>
    %319 = tpu.matmul %6, %310, %cst_135 {dimension_numbers = #tpu.dot_dimension_numbers<[1], [0], [0], [1], [0, 0, 1, 1], [], []>} : vector<4x8xf32>, vector<8x16xf32>, vector<4x16xf32> -> vector<4x16xf32>
    %320 = vector.broadcast %7 : vector<4x1xf32> to vector<4x16xf32>
    %321 = arith.addf %319, %320 : vector<4x16xf32>
    %322 = vector.broadcast %257 : vector<4x1xf32> to vector<4x16xf32>
    %323 = arith.mulf %321, %322 : vector<4x16xf32>
    %324 = vector.broadcast %249 : vector<4x1xf32> to vector<4x16xf32>
    %325 = arith.addf %323, %324 : vector<4x16xf32>
    %c1_136 = arith.constant 1 : index
    %c0_137 = arith.constant 0 : index
    %c0_138 = arith.constant 0 : index
    %326 = vector.load %arg13[%c1_136, %c0_137, %c0_138] : memref<2x4x16xf32, #tpu.memory_space<vmem>>, vector<1x4x16xf32>
    %327 = vector.shape_cast %326 : vector<1x4x16xf32> to vector<4x16xf32>
    %328 = vector.shape_cast %325 : vector<4x16xf32> to vector<1x4x16xf32>
    tpu.vector_store %arg13[%c1_136, %c0_137, %c0_138], %328 {strides = array<i32>} : memref<2x4x16xf32, #tpu.memory_space<vmem>>, vector<1x4x16xf32>,
    %329 = arith.subf %325, %243 : vector<4x16xf32>
    %330 = arith.mulf %329, %329 : vector<4x16xf32>
    %331 = vector.shape_cast %330 : vector<4x16xf32> to vector<1x4x16xf32>
    %cst_139 = arith.constant dense<0.000000e+00> : vector<1xf32>
    %332 = vector.multi_reduction <add>, %331, %cst_139 [1, 2] : vector<1x4x16xf32> to vector<1xf32>
    %333 = vector.shape_cast %332 : vector<1xf32> to vector<1x1x1xf32>
    %334 = vector.extract %333[0, 0, 0] : f32 from vector<1x1x1xf32>
    %cst_140 = arith.constant 6.400000e+01 : f32
    %335 = arith.divf %334, %cst_140 : f32
    %336 = arith.addf %109, %335 : f32
    %cst_141 = arith.constant dense<0.000000e+00> : vector<16xf32>
    %337 = vector.multi_reduction <add>, %325, %cst_141 [0] : vector<4x16xf32> to vector<16xf32>
    %338 = vector.shape_cast %337 : vector<16xf32> to vector<1x16xf32>
    %cst_142 = arith.constant 4.000000e+00 : f32
    %339 = vector.broadcast %cst_142 : f32 to vector<1x16xf32>
    %340 = arith.divf %338, %339 : vector<1x16xf32>
    %341 = vector.broadcast %340 : vector<1x16xf32> to vector<4x16xf32>
    %342 = arith.subf %325, %341 : vector<4x16xf32>
    %cst_143 = arith.constant dense<0.000000e+00> : vector<16xf32>
    %343 = vector.multi_reduction <add>, %243, %cst_143 [0] : vector<4x16xf32> to vector<16xf32>
    %344 = vector.shape_cast %343 : vector<16xf32> to vector<1x16xf32>
    %cst_144 = arith.constant 4.000000e+00 : f32
    %345 = vector.broadcast %cst_144 : f32 to vector<1x16xf32>
    %346 = arith.divf %344, %345 : vector<1x16xf32>
    %347 = vector.broadcast %346 : vector<1x16xf32> to vector<4x16xf32>
    %348 = arith.subf %243, %347 : vector<4x16xf32>
    %349 = arith.mulf %342, %342 : vector<4x16xf32>
    %cst_145 = arith.constant dense<0.000000e+00> : vector<16xf32>
    %350 = vector.multi_reduction <add>, %349, %cst_145 [0] : vector<4x16xf32> to vector<16xf32>
    %351 = vector.shape_cast %350 : vector<16xf32> to vector<1x16xf32>
    %cst_146 = arith.constant 9.99999993E-9 : f32
    %352 = vector.broadcast %cst_146 : f32 to vector<1x16xf32>
    %353 = arith.maximumf %351, %352 : vector<1x16xf32>
    %354 = arith.mulf %348, %348 : vector<4x16xf32>
    %cst_147 = arith.constant dense<0.000000e+00> : vector<16xf32>
    %355 = vector.multi_reduction <add>, %354, %cst_147 [0] : vector<4x16xf32> to vector<16xf32>
    %356 = vector.shape_cast %355 : vector<16xf32> to vector<1x16xf32>
    %cst_148 = arith.constant 9.99999993E-9 : f32
    %357 = vector.broadcast %cst_148 : f32 to vector<1x16xf32>
    %358 = arith.maximumf %356, %357 : vector<1x16xf32>
    %359 = arith.mulf %342, %348 : vector<4x16xf32>
    %cst_149 = arith.constant dense<0.000000e+00> : vector<16xf32>
    %360 = vector.multi_reduction <add>, %359, %cst_149 [0] : vector<4x16xf32> to vector<16xf32>
    %361 = vector.shape_cast %360 : vector<16xf32> to vector<1x16xf32>
    %362 = arith.mulf %353, %358 : vector<1x16xf32>
    %363 = math.sqrt %362 : vector<1x16xf32>
    %cst_150 = arith.constant 9.99999993E-9 : f32
    %364 = vector.broadcast %cst_150 : f32 to vector<1x16xf32>
    %365 = arith.addf %363, %364 : vector<1x16xf32>
    %366 = arith.divf %361, %365 : vector<1x16xf32>
    %cst_151 = arith.constant -1.000000e+00 : f32
    %cst_152 = arith.constant 1.000000e+00 : f32
    %367 = vector.broadcast %cst_151 : f32 to vector<1x16xf32>
    %368 = arith.maximumf %367, %366 : vector<1x16xf32>
    %369 = vector.broadcast %cst_152 : f32 to vector<1x16xf32>
    %370 = arith.minimumf %369, %368 : vector<1x16xf32>
    %cst_153 = arith.constant 1.000000e+00 : f32
    %371 = vector.broadcast %cst_153 : f32 to vector<1x16xf32>
    %372 = arith.subf %371, %370 : vector<1x16xf32>
    %373 = vector.shape_cast %372 : vector<1x16xf32> to vector<1x1x16xf32>
    %cst_154 = arith.constant dense<0.000000e+00> : vector<1xf32>
    %374 = vector.multi_reduction <add>, %373, %cst_154 [1, 2] : vector<1x1x16xf32> to vector<1xf32>
    %375 = vector.shape_cast %374 : vector<1xf32> to vector<1x1x1xf32>
    %376 = vector.extract %375[0, 0, 0] : f32 from vector<1x1x1xf32>
    %cst_155 = arith.constant 1.600000e+01 : f32
    %377 = arith.divf %376, %cst_155 : f32
    %378 = arith.addf %151, %377 : f32
    %379 = vector.extract_strided_slice %325 {offsets = [1, 0], sizes = [3, 16], strides = [1, 1]} : vector<4x16xf32> to vector<3x16xf32>
    %380 = vector.extract_strided_slice %325 {offsets = [0, 0], sizes = [3, 16], strides = [1, 1]} : vector<4x16xf32> to vector<3x16xf32>
    %381 = arith.subf %379, %380 : vector<3x16xf32>
    %382 = vector.extract_strided_slice %243 {offsets = [1, 0], sizes = [3, 16], strides = [1, 1]} : vector<4x16xf32> to vector<3x16xf32>
    %383 = vector.extract_strided_slice %243 {offsets = [0, 0], sizes = [3, 16], strides = [1, 1]} : vector<4x16xf32> to vector<3x16xf32>
    %384 = arith.subf %382, %383 : vector<3x16xf32>
    %385 = arith.subf %381, %384 : vector<3x16xf32>
    %386 = arith.mulf %385, %385 : vector<3x16xf32>
    %387 = vector.shape_cast %386 : vector<3x16xf32> to vector<1x3x16xf32>
    %cst_156 = arith.constant dense<0.000000e+00> : vector<1xf32>
    %388 = vector.multi_reduction <add>, %387, %cst_156 [1, 2] : vector<1x3x16xf32> to vector<1xf32>
    %389 = vector.shape_cast %388 : vector<1xf32> to vector<1x1x1xf32>
    %390 = vector.extract %389[0, 0, 0] : f32 from vector<1x1x1xf32>
    %cst_157 = arith.constant 4.800000e+01 : f32
    %391 = arith.divf %390, %cst_157 : f32
    %392 = arith.addf %165, %391 : f32
    %cst_158 = arith.constant dense<0.000000e+00> : vector<4x16xf32>
    %393 = tpu.matmul %325, %11, %cst_158 {dimension_numbers = #tpu.dot_dimension_numbers<[1], [0], [0], [1], [0, 0, 1, 1], [], []>} : vector<4x16xf32>, vector<16x16xf32>, vector<4x16xf32> -> vector<4x16xf32>
    %cst_159 = arith.constant dense<0.000000e+00> : vector<4x16xf32>
    %394 = tpu.matmul %243, %11, %cst_159 {dimension_numbers = #tpu.dot_dimension_numbers<[1], [0], [0], [1], [0, 0, 1, 1], [], []>} : vector<4x16xf32>, vector<16x16xf32>, vector<4x16xf32> -> vector<4x16xf32>
    %395 = arith.mulf %393, %393 : vector<4x16xf32>
    %396 = arith.mulf %394, %394 : vector<4x16xf32>
    %397 = arith.mulf %393, %394 : vector<4x16xf32>
    %398 = arith.mulf %325, %325 : vector<4x16xf32>
    %cst_160 = arith.constant dense<0.000000e+00> : vector<4x16xf32>
    %399 = tpu.matmul %398, %11, %cst_160 {dimension_numbers = #tpu.dot_dimension_numbers<[1], [0], [0], [1], [0, 0, 1, 1], [], []>} : vector<4x16xf32>, vector<16x16xf32>, vector<4x16xf32> -> vector<4x16xf32>
    %400 = arith.subf %399, %395 : vector<4x16xf32>
    %401 = arith.mulf %243, %243 : vector<4x16xf32>
    %cst_161 = arith.constant dense<0.000000e+00> : vector<4x16xf32>
    %402 = tpu.matmul %401, %11, %cst_161 {dimension_numbers = #tpu.dot_dimension_numbers<[1], [0], [0], [1], [0, 0, 1, 1], [], []>} : vector<4x16xf32>, vector<16x16xf32>, vector<4x16xf32> -> vector<4x16xf32>
    %403 = arith.subf %402, %396 : vector<4x16xf32>
    %404 = arith.mulf %325, %243 : vector<4x16xf32>
    %cst_162 = arith.constant dense<0.000000e+00> : vector<4x16xf32>
    %405 = tpu.matmul %404, %11, %cst_162 {dimension_numbers = #tpu.dot_dimension_numbers<[1], [0], [0], [1], [0, 0, 1, 1], [], []>} : vector<4x16xf32>, vector<16x16xf32>, vector<4x16xf32> -> vector<4x16xf32>
    %406 = arith.subf %405, %397 : vector<4x16xf32>
    %cst_163 = arith.constant 2.000000e+00 : f32
    %407 = vector.broadcast %cst_163 : f32 to vector<4x16xf32>
    %408 = arith.mulf %407, %397 : vector<4x16xf32>
    %cst_164 = arith.constant 9.99999974E-5 : f32
    %409 = vector.broadcast %cst_164 : f32 to vector<4x16xf32>
    %410 = arith.addf %408, %409 : vector<4x16xf32>
    %cst_165 = arith.constant 2.000000e+00 : f32
    %411 = vector.broadcast %cst_165 : f32 to vector<4x16xf32>
    %412 = arith.mulf %411, %406 : vector<4x16xf32>
    %cst_166 = arith.constant 8.99999984E-4 : f32
    %413 = vector.broadcast %cst_166 : f32 to vector<4x16xf32>
    %414 = arith.addf %412, %413 : vector<4x16xf32>
    %415 = arith.mulf %410, %414 : vector<4x16xf32>
    %416 = arith.addf %395, %396 : vector<4x16xf32>
    %cst_167 = arith.constant 9.99999974E-5 : f32
    %417 = vector.broadcast %cst_167 : f32 to vector<4x16xf32>
    %418 = arith.addf %416, %417 : vector<4x16xf32>
    %419 = arith.addf %400, %403 : vector<4x16xf32>
    %cst_168 = arith.constant 8.99999984E-4 : f32
    %420 = vector.broadcast %cst_168 : f32 to vector<4x16xf32>
    %421 = arith.addf %419, %420 : vector<4x16xf32>
    %422 = arith.mulf %418, %421 : vector<4x16xf32>
    %423 = arith.divf %415, %422 : vector<4x16xf32>
    %cst_169 = arith.constant 1.000000e+00 : f32
    %424 = vector.broadcast %cst_169 : f32 to vector<4x16xf32>
    %425 = arith.subf %424, %423 : vector<4x16xf32>
    %426 = vector.shape_cast %425 : vector<4x16xf32> to vector<1x4x16xf32>
    %cst_170 = arith.constant dense<0.000000e+00> : vector<1xf32>
    %427 = vector.multi_reduction <add>, %426, %cst_170 [1, 2] : vector<1x4x16xf32> to vector<1xf32>
    %428 = vector.shape_cast %427 : vector<1xf32> to vector<1x1x1xf32>
    %429 = vector.extract %428[0, 0, 0] : f32 from vector<1x1x1xf32>
    %cst_171 = arith.constant 6.400000e+01 : f32
    %430 = arith.divf %429, %cst_171 : f32
    %431 = arith.addf %204, %430 : f32
    %cst_172 = arith.constant dense<0.000000e+00> : vector<4xf32>
    %432 = vector.multi_reduction <add>, %245, %cst_172 [1] : vector<4x16xf32> to vector<4xf32>
    %433 = vector.shape_cast %432 : vector<4xf32> to vector<4x1xf32>
    %cst_173 = arith.constant 1.600000e+01 : f32
    %434 = vector.broadcast %cst_173 : f32 to vector<4x1xf32>
    %435 = arith.divf %433, %434 : vector<4x1xf32>
    %436 = arith.mulf %8, %435 : vector<4x1xf32>
    %437 = vector.shape_cast %436 : vector<4x1xf32> to vector<1x4x1xf32>
    %cst_174 = arith.constant dense<0.000000e+00> : vector<1xf32>
    %438 = vector.multi_reduction <add>, %437, %cst_174 [1, 2] : vector<1x4x1xf32> to vector<1xf32>
    %439 = vector.shape_cast %438 : vector<1xf32> to vector<1x1x1xf32>
    %440 = vector.extract %439[0, 0, 0] : f32 from vector<1x1x1xf32>
    %441 = arith.addf %440, %10 : f32
    %cst_175 = arith.constant dense<0.000000e+00> : vector<4xf32>
    %442 = vector.multi_reduction <add>, %325, %cst_175 [1] : vector<4x16xf32> to vector<4xf32>
    %443 = vector.shape_cast %442 : vector<4xf32> to vector<4x1xf32>
    %cst_176 = arith.constant 1.600000e+01 : f32
    %444 = vector.broadcast %cst_176 : f32 to vector<4x1xf32>
    %445 = arith.divf %443, %444 : vector<4x1xf32>
    %446 = arith.mulf %8, %445 : vector<4x1xf32>
    %447 = vector.shape_cast %446 : vector<4x1xf32> to vector<1x4x1xf32>
    %cst_177 = arith.constant dense<0.000000e+00> : vector<1xf32>
    %448 = vector.multi_reduction <add>, %447, %cst_177 [1, 2] : vector<1x4x1xf32> to vector<1xf32>
    %449 = vector.shape_cast %448 : vector<1xf32> to vector<1x1x1xf32>
    %450 = vector.extract %449[0, 0, 0] : f32 from vector<1x1x1xf32>
    %451 = arith.addf %450, %10 : f32
    %cst_178 = arith.constant 0.000000e+00 : f32
    %452 = arith.subf %cst_178, %441 : f32
    %cst_179 = arith.constant 0.000000e+00 : f32
    %453 = arith.maximumf %452, %cst_179 : f32
    %454 = math.absf %452 : f32
    %cst_180 = arith.constant 0.000000e+00 : f32
    %455 = arith.subf %cst_180, %454 : f32
    %456 = math.exp %455 : f32
    %cst_181 = arith.constant 1.000000e+00 : f32
    %457 = arith.addf %cst_181, %456 : f32
    %458 = math.log %457 : f32
    %459 = arith.addf %453, %458 : f32
    %cst_182 = arith.constant 0.000000e+00 : f32
    %460 = arith.maximumf %451, %cst_182 : f32
    %461 = math.absf %451 : f32
    %cst_183 = arith.constant 0.000000e+00 : f32
    %462 = arith.subf %cst_183, %461 : f32
    %463 = math.exp %462 : f32
    %cst_184 = arith.constant 1.000000e+00 : f32
    %464 = arith.addf %cst_184, %463 : f32
    %465 = math.log %464 : f32
    %466 = arith.addf %460, %465 : f32
    %467 = arith.addf %459, %466 : f32
    %468 = arith.addf %241, %467 : f32
    %cst_185 = arith.constant 5.000000e-01 : f32
    %469 = arith.mulf %336, %cst_185 : f32
    %cst_186 = arith.constant 5.000000e-01 : f32
    %470 = arith.mulf %378, %cst_186 : f32
    %cst_187 = arith.constant 5.000000e-01 : f32
    %471 = arith.mulf %392, %cst_187 : f32
    %cst_188 = arith.constant 5.000000e-01 : f32
    %472 = arith.mulf %431, %cst_188 : f32
    %cst_189 = arith.constant 5.000000e-01 : f32
    %473 = arith.mulf %468, %cst_189 : f32
    %cst_190 = arith.constant 5.000000e-01 : f32
    %474 = arith.mulf %318, %cst_190 : f32
    %cst_191 = arith.constant 1.000000e-01 : f32
    %475 = arith.mulf %cst_191, %469 : f32
    %cst_192 = arith.constant 1.000000e-01 : f32
    %476 = arith.mulf %cst_192, %470 : f32
    %477 = arith.addf %475, %476 : f32
    %cst_193 = arith.constant 1.000000e-01 : f32
    %478 = arith.mulf %cst_193, %471 : f32
    %479 = arith.addf %477, %478 : f32
    %cst_194 = arith.constant 3.500000e-01 : f32
    %480 = arith.mulf %cst_194, %472 : f32
    %481 = arith.addf %479, %480 : f32
    %cst_195 = arith.constant 3.500000e-01 : f32
    %482 = arith.mulf %cst_195, %473 : f32
    %483 = arith.addf %481, %482 : f32
    %484 = arith.addf %483, %474 : f32
    %485 = tpu.iota {dimensions = array<i32: 1>} : vector<1x128xi32>
    %c0_i32_196 = arith.constant 0 : i32
    %486 = vector.broadcast %c0_i32_196 : i32 to vector<1x128xi32>
    %487 = arith.cmpi eq, %485, %486 : vector<1x128xi32>
    %cst_197 = arith.constant 0.000000e+00 : f32
    %488 = vector.broadcast %469 : f32 to vector<1x128xf32>
    %489 = vector.broadcast %cst_197 : f32 to vector<1x128xf32>
    %490 = arith.select %487, %488, %489 : vector<1x128xi1>, vector<1x128xf32>
    %c1_i32 = arith.constant 1 : i32
    %491 = vector.broadcast %c1_i32 : i32 to vector<1x128xi32>
    %492 = arith.cmpi eq, %485, %491 : vector<1x128xi32>
    %cst_198 = arith.constant 0.000000e+00 : f32
    %493 = vector.broadcast %470 : f32 to vector<1x128xf32>
    %494 = vector.broadcast %cst_198 : f32 to vector<1x128xf32>
    %495 = arith.select %492, %493, %494 : vector<1x128xi1>, vector<1x128xf32>
    %496 = arith.addf %490, %495 : vector<1x128xf32>
    %c2_i32 = arith.constant 2 : i32
    %497 = vector.broadcast %c2_i32 : i32 to vector<1x128xi32>
    %498 = arith.cmpi eq, %485, %497 : vector<1x128xi32>
    %cst_199 = arith.constant 0.000000e+00 : f32
    %499 = vector.broadcast %471 : f32 to vector<1x128xf32>
    %500 = vector.broadcast %cst_199 : f32 to vector<1x128xf32>
    %501 = arith.select %498, %499, %500 : vector<1x128xi1>, vector<1x128xf32>
    %502 = arith.addf %496, %501 : vector<1x128xf32>
    %c3_i32 = arith.constant 3 : i32
    %503 = vector.broadcast %c3_i32 : i32 to vector<1x128xi32>
    %504 = arith.cmpi eq, %485, %503 : vector<1x128xi32>
    %cst_200 = arith.constant 0.000000e+00 : f32
    %505 = vector.broadcast %472 : f32 to vector<1x128xf32>
    %506 = vector.broadcast %cst_200 : f32 to vector<1x128xf32>
    %507 = arith.select %504, %505, %506 : vector<1x128xi1>, vector<1x128xf32>
    %508 = arith.addf %502, %507 : vector<1x128xf32>
    %c4_i32 = arith.constant 4 : i32
    %509 = vector.broadcast %c4_i32 : i32 to vector<1x128xi32>
    %510 = arith.cmpi eq, %485, %509 : vector<1x128xi32>
    %cst_201 = arith.constant 0.000000e+00 : f32
    %511 = vector.broadcast %473 : f32 to vector<1x128xf32>
    %512 = vector.broadcast %cst_201 : f32 to vector<1x128xf32>
    %513 = arith.select %510, %511, %512 : vector<1x128xi1>, vector<1x128xf32>
    %514 = arith.addf %508, %513 : vector<1x128xf32>
    %c5_i32 = arith.constant 5 : i32
    %515 = vector.broadcast %c5_i32 : i32 to vector<1x128xi32>
    %516 = arith.cmpi eq, %485, %515 : vector<1x128xi32>
    %cst_202 = arith.constant 0.000000e+00 : f32
    %517 = vector.broadcast %474 : f32 to vector<1x128xf32>
    %518 = vector.broadcast %cst_202 : f32 to vector<1x128xf32>
    %519 = arith.select %516, %517, %518 : vector<1x128xi1>, vector<1x128xf32>
    %520 = arith.addf %514, %519 : vector<1x128xf32>
    %c6_i32 = arith.constant 6 : i32
    %521 = vector.broadcast %c6_i32 : i32 to vector<1x128xi32>
    %522 = arith.cmpi eq, %485, %521 : vector<1x128xi32>
    %cst_203 = arith.constant 0.000000e+00 : f32
    %523 = vector.broadcast %483 : f32 to vector<1x128xf32>
    %524 = vector.broadcast %cst_203 : f32 to vector<1x128xf32>
    %525 = arith.select %522, %523, %524 : vector<1x128xi1>, vector<1x128xf32>
    %526 = arith.addf %520, %525 : vector<1x128xf32>
    %c7_i32 = arith.constant 7 : i32
    %527 = vector.broadcast %c7_i32 : i32 to vector<1x128xi32>
    %528 = arith.cmpi eq, %485, %527 : vector<1x128xi32>
    %cst_204 = arith.constant 0.000000e+00 : f32
    %529 = vector.broadcast %484 : f32 to vector<1x128xf32>
    %530 = vector.broadcast %cst_204 : f32 to vector<1x128xf32>
    %531 = arith.select %528, %529, %530 : vector<1x128xi1>, vector<1x128xf32>
    %532 = arith.addf %526, %531 : vector<1x128xf32>
    %c0_205 = arith.constant 0 : index
    %c0_206 = arith.constant 0 : index
    %533 = vector.load %arg16[%c0_205, %c0_206] : memref<1x128xf32, #tpu.memory_space<vmem>>, vector<1x128xf32>
    tpu.vector_store %arg16[%c0_205, %c0_206], %532 {strides = array<i32>} : memref<1x128xf32, #tpu.memory_space<vmem>>, vector<1x128xf32>,
    return
  }
}

</mosaic_0001>

<bundles_post_ra>
// kernel: neural_encodec_forward.1
= control target key start
LH: loop header
LB: loop body
LE: loop exit
PB: predicated region body
PF: predicated region fallthrough
CT: control target
= control target key end

     0   :  { %s3267_s0 = inlined_call_operand.vmem [shape: f32[2,4,16], index: 0, kind: input, shape index: {}]   ;;  %s3268_s1 = inlined_call_operand.vmem [shape: f32[2,4,16], index: 1, kind: input, shape index: {}]   ;;  %s3269_s2 = inlined_call_operand.vmem [shape: f32[16,4], index: 2, kind: input, shape index: {}]   ;;  %s3270_s3 = inlined_call_operand.vmem [shape: f32[16,1], index: 3, kind: input, shape index: {}]   ;;  %s3271_s4 = inlined_call_operand.vmem [shape: f32[8,16], index: 4, kind: input, shape index: {}]   ;;  %s3272_s5 = inlined_call_operand.vmem [shape: f32[8,1], index: 5, kind: input, shape index: {}]   ;;  %s3273_s6 = inlined_call_operand.vmem [shape: f32[16,8], index: 6, kind: input, shape index: {}]   ;;  %s3274_s7 = inlined_call_operand.vmem [shape: f32[8,16], index: 7, kind: input, shape index: {}]   ;;  %s3275_s8 = inlined_call_operand.vmem [shape: f32[4,8], index: 8, kind: input, shape index: {}]   ;;  %s3276_s9 = inlined_call_operand.vmem [shape: f32[4,1], index: 9, kind: input, shape index: {}]   ;;  %s3277_s10 = inlined_call_operand.vmem [shape: f32[4,1], index: 10, kind: input, shape index: {}]   ;;  %s3278_s11 = inlined_call_operand.<no memory space> [shape: f32[1,1], index: 11, kind: input, shape index: {}]   ;;  %s3279_s12 = inlined_call_operand.vmem [shape: f32[16,16], index: 12, kind: input, shape index: {}]   ;;  %s3280_s13 = inlined_call_operand.hbm [shape: f32[2,4,16], index: 13, kind: output, shape index: {0}]   ;;  %s3281_s14 = inlined_call_operand.hbm [shape: f32[2,8,16], index: 14, kind: output, shape index: {1}]   ;;  %s3282_s15 = inlined_call_operand.vmem [shape: f32[2,4,2], index: 15, kind: output, shape index: {2}]   ;;  %s3283_s16 = inlined_call_operand.vmem [shape: f32[1,128], index: 16, kind: output, shape index: {3}]  }
   0x1   :  { %3285 = sst [smem:[#allocation9_spill]] %s3267_s0  ;;  %v22_v0 = vstv %s3278_s11 }
   0x2   :  { %23 = vst [vmem:[#allocation2] sm:$0x1] %v22_v0 }
   0x3   :  { %24 = vsyncpa [#allocation4], 0  ;;  %s3286_s25 = sld [smem:[#allocation9_spill]]  ;;  %vm79_vm0 = vcmask 125952  }
   0x9   :  { %v2792_v1 = vld [vmem:[%s3286_s25] sm:$0xf] }
   0xa   :  { %25 = vsyncpa [#allocation6], 0  ;;  %v2796_v2 = vsel %vm79_vm0, %v2792_v1, 0.0  ;;  %v2807_v8 = vld [vmem:[%s3269_s2] sm:$0xff]  ;;  %vm118_vm1 = vcmask 31744   ;;  %v2689_v10 = vmov 0   ;;  %v102_v23 = vlaneseq }
   0xb   :  { %81 = vadd.xlane.f32.xlu0 %v2796_v2  ;;  %2376 = vmatprep.mubr.msk.f32.mxu0 %vm118_vm1, %v2807_v8  ;;  %v54_v9 = vld [vmem:[%s3270_s3] sm:$0xff]  ;;  %v55_v11 = vld [vmem:[%s3270_s3 + $0x8] sm:$0xff]  ;;  %vm70_vm2 = vcmask 64512   ;;  %vm106_vm6 = vcmask 11264   ;;  %vm125_vm7 = vcmask 1043456   ;;  %v2690_v35 = vmov 0.0|0.0  }
   0xc   :  { %2602 = vset.pattern.permute.xlu1 %v2689_v10  ;;  %2603 = vset.pattern.permute.xlu0 %v2689_v10  ;;  %v2820_v12 = vld [vmem:[%s3273_s6] sm:$0xff]  ;;  %v2827_v14 = vld [vmem:[%s3273_s6 + $0x8] sm:$0xff]  ;;  %v2847_v24 = vand.u32 127, %v102_v23  ;;  %vm2691_vm8 = vmmov 0   ;;  %v2692_v36 = vmov 0.0   ;;  %vm211_vm9 = vcmask 130048  }
   0xd   :  { %110 = vperm.xlu1 %2602, %v54_v9   ;;  %v68_v13 = vmul.f32 %v2820_v12, %v2820_v12  ;;  %v69_v16 = vmul.f32 %v2827_v14, %v2827_v14  ;;  %v2836_v18 = vld [vmem:[%s3286_s25 + $0x4] sm:$0xf]  ;;  %v62_v20 = vld [vmem:[%s3276_s9] sm:$0xf]  ;;  %v2864_v34 = vld [vmem:[%s3269_s2 + $0x8] sm:$0xff]  ;;  %2502 = vmatprep.subr.bf16.mxu1 %v2690_v35  ;;  %s2694_s17 = smov 0.0  }
   0xe   :  { %v2840_v19 = vsel %vm79_vm0, %v2836_v18, 0.0  ;;  %vm104_vm4 = vcmp.eq.s32.totalorder %v2847_v24, 0  ;;  %2383 = vmatprep.mubr.msk.f32.mxu1 %vm2691_vm8, %v2692_v36  ;;  %v57_v37 = vld [vmem:[%s3272_s5] sm:$0xff] }
   0xf   :  { %v71_v15 = vsel %vm70_vm2, %v68_v13, 0.0  ;;  %v74_v17 = vsel %vm70_vm2, %v69_v16, 0.0  ;;  %v2887_v47 = vld [vmem:[%s3271_s4] sm:$0xff] }
  0x11   :  { %115 = vperm.xlu1 %2602, %v55_v11  }
  0x35   :  { %72 = vadd.xlane.f32.xlu1 %v71_v15 }
  0x39   :  { %75 = vadd.xlane.f32.xlu1 %v74_v17 }
  0x3d   :  { %1166 = vadd.xlane.f32.xlu1 %v2840_v19 }
  0x4e   :  { %505 = vperm.xlu1 %2602, %v62_v20  }
  0x8c   :  { %v2878_v38 = vpop.permute.xlu1 %110 }
  0x90   :  { %v2880_v39 = vpop.permute.xlu1 %115 }
  0x98   :  { %v82_v3 = vpop.xlane.xlu0 %81 }
  0x99   :  { %v2799_v4 = vmul.f32 0.0625, %v82_v3 }
  0x9b   :  { %v85_v5 = vsub.f32 %v2792_v1, %v2799_v4 }
  0x9d   :  { %v86_v6 = vmul.f32 %v85_v5, %v85_v5 }
  0x9f   :  { %v87_v7 = vsel %vm79_vm0, %v86_v6, 0.0 }
  0xa0   :  { %88 = vadd.xlane.f32.xlu0 %v87_v7 }
  0xb6   :  { %208 = vperm.xlu0 %2603, %v57_v37   ;;  %v382_v37 = vshrl.u32 %v102_v23, 7 }
  0xc2   :  { %v2894_v48 = vpop.xlane.xlu1 %72 }
  0xc6   :  { %v2896_v49 = vpop.xlane.xlu1 %75 }
  0xca   :  { %v1167_v50 = vpop.xlane.xlu1 %1166 }
  0xcb   :  { %v2898_v51 = vmul.f32 0.0625, %v1167_v50 }
  0xcd   :  { %v2902_v52 = vsub.f32 %v2836_v18, %v2898_v51 }
  0xcf   :  { %v1170_v53 = vmul.f32 %v2902_v52, %v2902_v52 }
  0xd1   :  { %v1171_v54 = vsel %vm79_vm0, %v1170_v53, 0.0 }
  0xd5   :  { %1172 = vadd.xlane.f32.xlu0 %v1171_v54 }
 0x12d   :  { %v89_v21 = vpop.xlane.xlu0 %88 }
 0x12e   :  { %v91_v22 = vmul.f32 0.06666667, %v89_v21 }
 0x130   :  { %2604 = vrsqrt.f32 %v91_v22  ;;  %vm94_vm3 = vcmp.eq.f32.partialorder %v91_v22, inf  ;;  %v97_v27 = vand.u32 2147483648, %v91_v22  ;;  %vm96_vm5 = vcmp.eq.f32.partialorder %v91_v22, 0.0 }
 0x135   :  { %v2907_v55 = vpop.permute.xlu0 %208 }
 0x13a   :  { %v2605_v25 = vpop.eup %2604 }
 0x13b   :  { %v93_v26 = vmul.f32 %v2605_v25, %v91_v22 }
 0x13d   :  { %v95_v28 = vsel %vm94_vm3, %v91_v22, %v93_v26 }
 0x13e   :  { %v2850_v29 = vsel %vm96_vm5, %v97_v27, %v95_v28 }
 0x13f   :  { %v99_v30 = vadd.f32 1e-08, %v2850_v29  ;;  %v105_v31 = vsel %vm104_vm4, %v2799_v4, %v2850_v29 }
 0x140   :  { %107 = vst.msk [vmem:[%s3282_s15] sm:$0xf] %vm106_vm6, %v105_v31 }
 0x141   :  { %2606 = vrcp.f32 %v99_v30 }
 0x14b   :  { %v2607_v32 = vpop.eup %2606 }
 0x14c   :  { %v101_v33 = vmul.f32 %v2607_v32, %v85_v5 }
 0x14e   :  { %2374 = vmatprep.subr.msk.mxu0 %vm125_vm7, %v101_v33 }
 0x14f   :  { %2375 = vmatpush3.msk.msra.mxu0 %vm125_vm7, %v101_v33 }
 0x150   :  { %2377 = vmatmul.mubr.msk.f32.vlgmr.msra.gmra.mrb[0].mxu0 %vm118_vm1, %v2864_v34 }
 0x151   :  { %2388 = vmatprep.mubr.msk.f32.mxu0 %vm70_vm2, %v2820_v12 }
 0x162   :  { %v1173_v59 = vpop.xlane.xlu0 %1172 }
 0x163   :  { %v1174_v60 = vmul.f32 0.06666667, %v1173_v59 }
 0x165   :  { %2608 = vrsqrt.f32 %v1174_v60  ;;  %vm1177_vm10 = vcmp.eq.f32.partialorder %v1174_v60, inf  ;;  %v1180_v63 = vand.u32 2147483648, %v1174_v60  ;;  %vm1179_vm11 = vcmp.eq.f32.partialorder %v1174_v60, 0.0 }
 0x16f   :  { %v2609_v61 = vpop.eup %2608 }
 0x170   :  { %v1176_v62 = vmul.f32 %v2609_v61, %v1174_v60 }
 0x172   :  { %v1178_v0 = vsel %vm1177_vm10, %v1174_v60, %v1176_v62  ;;  %vm1105_vm10 = vcmask 3072  }
 0x173   :  { %v2921_v3 = vsel %vm1179_vm11, %v1180_v63, %v1178_v0 }
 0x174   :  { %v1185_v5 = vsel %vm104_vm4, %v2898_v51, %v2921_v3 }
 0x175   :  { %2297 = vst.msk [vmem:[%s3282_s15 + $0x4] sm:$0xf] %vm106_vm6, %v1185_v5  ;;  %v2693_v5 = vmov 1.0|1.0  }
 0x223   :  { %v2378_v40 = vpop.f32.mrb[0].mxu0 }
 0x224   :  { %v201_v41 = vadd.f32 %v2378_v40, %v2880_v39  ;;  %v195_v42 = vpop.f32.mrb[1].mxu0 }
 0x225   :  { %v196_v43 = vadd.f32 %v195_v42, %v2878_v38  ;;  %v383_v42 = vadd.s32 8, %v382_v37 }
 0x226   :  { %v205_v44 = vmax.f32 %v201_v41, 0.0 }
 0x227   :  { %v204_v45 = vmax.f32 %v196_v43, 0.0 }
 0x229   :  { %v2503_v46 = vpack.c.bf16 %v205_v44, %v204_v45  ;;  %v2939_v45 = vcvt.s32.f32 %v382_v37 }
 0x22b   :  { %2504 = vmatpush3.bf16.msra.mxu1 %v2503_v46  ;;  %v2941_v46 = vcvt.s32.f32 %v383_v42 }
 0x22c   :  { %2505 = vmatprep.subr.bf16.mxu1 %v2690_v35 }
 0x22e   :  { %2384 = vmatmul.mubr.msk.f32.vlgmr.msra.gmra.mrb[0].mxu1 %vm211_vm9, %v2887_v47 }
 0x22f   :  { %2395 = vmatprep.mubr.msk.f32.mxu1 %vm2691_vm8, %v2692_v36 }
 0x301   :  { %v281_v56 = vpop.f32.mrb[0].mxu1 }
 0x302   :  { %v2910_v57 = vadd.f32 %v281_v56, %v2907_v55  ;;  %v2385_v58 = vpop.f32.mrb[1].mxu1 }
 0x304   :  { %285 = vst.msk [vmem:[#allocation5] sm:$0xff] %vm211_vm9, %v2910_v57  ;;  %2386 = vmatprep.subr.mxu0 %v2910_v57  ;;  %v367_v6 = vmul.f32 %v2910_v57, %v2910_v57 }
 0x305   :  { %2387 = vmatpush3.msra.mxu0 %v2910_v57 }
 0x306   :  { %2389 = vmatmul.mubr.msk.f32.vlgmr.msra.gmra.mrb[2].mxu0 %vm70_vm2, %v2827_v14  ;;  %2398 = vmatprep.subr.mxu0 %v2692_v36  ;;  %v368_v7 = vsel %vm211_vm9, %v367_v6, 0.0  ;;  %v2953_v6 = vld [vmem:[%s3274_s7] sm:$0xff] }
 0x307   :  { %2400 = vmatprep.mubr.msk.f32.mxu0 %vm2691_vm8, %v2692_v36  ;;  %v369_v9 = vrot.slane %v368_v7, 4 }
 0x309   :  { %v370_v10 = vadd.f32 %v369_v9, %v368_v7  ;;  %v66_v7 = vld [vmem:[%s3279_s12] sm:$0xff]  ;;  %v67_v9 = vld [vmem:[%s3279_s12 + $0x8] sm:$0xff] }
 0x30b   :  { %v371_v11 = vrot.slane %v370_v10, 2 }
 0x30d   :  { %v372_v13 = vadd.f32 %v371_v11, %v370_v10  ;;  %v2966_v10 = vpack.c.bf16 %v67_v9, %v66_v7  ;;  %v1182_v11 = vadd.f32 1e-08, %v2921_v3 }
 0x30f   :  { %v373_v15 = vrot.slane %v372_v13, 1  ;;  %2610 = vrcp.f32 %v1182_v11 }
 0x311   :  { %v374_v22 = vadd.f32 %v373_v15, %v372_v13  ;;  %v2974_v13 = vld [vmem:[%s3275_s8] sm:$0xf] }
 0x3d9   :  { %v2390_v16 = vpop.f32.mrb[2].mxu0 }
 0x3da   :  { %v376_v17 = vmul.f32 2.0, %v2390_v16  ;;  %v358_v20 = vpop.f32.mrb[3].mxu0 }
 0x3db   :  { %v375_v21 = vmul.f32 2.0, %v358_v20  ;;  %v2611_v20 = vpop.eup %2610 }
 0x3dc   :  { %v378_v25 = vsub.f32 %v2896_v49, %v376_v17 }
 0x3dd   :  { %v377_v26 = vsub.f32 %v2894_v48, %v375_v21 }
 0x3de   :  { %v380_v27 = vadd.f32 %v378_v25, %v374_v22  ;;  %v923_v25 = vmul.f32 %v2792_v1, %v2792_v1 }
 0x3df   :  { %v379_v28 = vadd.f32 %v377_v26, %v374_v22 }
 0x3e0   :  { %v387_v30 = vsel %vm211_vm9, %v380_v27, inf }
 0x3e1   :  { %v386_v31 = vsel %vm211_vm9, %v379_v28, inf }
 0x3e2   :  { %v388_v32 = vmin.f32 %v386_v31, %v387_v30 }
 0x3e4   :  { %v389_v33 = vrot.slane %v388_v32, 4 }
 0x3e6   :  { %v390_v40 = vmin.f32 %v388_v32, %v389_v33 }
 0x3e8   :  { %v391_v41 = vrot.slane %v390_v40, 2 }
 0x3ea   :  { %v392_v43 = vmin.f32 %v390_v40, %v391_v41 }
 0x3ec   :  { %v393_v44 = vrot.slane %v392_v43, 1 }
 0x3ee   :  { %v394_v50 = vmin.f32 %v392_v43, %v393_v44 }
 0x3f0   :  { %vm395_vm12 = vcmp.le.f32.partialorder %v379_v28, %v394_v50  ;;  %vm396_vm13 = vcmp.le.f32.partialorder %v380_v27, %v394_v50  ;;  %v3008_v50 = vpop.permute.xlu1 %505 }
 0x3f1   :  { %v397_v53 = vsel %vm395_vm12, %v2939_v45, 16.0  ;;  %v398_v54 = vsel %vm396_vm13, %v2941_v46, 16.0 }
 0x3f2   :  { %v399_v56 = vsel %vm211_vm9, %v397_v53, inf  ;;  %v400_v23 = vsel %vm211_vm9, %v398_v54, inf }
 0x3f3   :  { %v401_v58 = vmin.f32 %v399_v56, %v400_v23 }
 0x3f5   :  { %v402_v59 = vrot.slane %v401_v58, 4 }
 0x3f7   :  { %v403_v60 = vmin.f32 %v401_v58, %v402_v59 }
 0x3f9   :  { %v404_v61 = vrot.slane %v403_v60, 2 }
 0x3fb   :  { %v405_v62 = vmin.f32 %v403_v60, %v404_v61  ;;  %v678_v60 = vrot.slane %v2792_v1, 7 }
 0x3fd   :  { %v406_v63 = vrot.slane %v405_v62, 1  ;;  %v680_v11 = vsub.f32 %v2792_v1, %v678_v60 }
 0x3ff   :  { %v407_v0 = vmin.f32 %v405_v62, %v406_v63 }
 0x401   :  { %vm408_vm14 = vcmp.eq.f32.partialorder %v2939_v45, %v407_v0  ;;  %vm409_vm15 = vcmp.eq.f32.partialorder %v2941_v46, %v407_v0 }
 0x402   :  { %vm2506_vm3 = vmpackc.low %vm409_vm15, %vm408_vm14 }
 0x403   :  { %2507 = vmatpush3.bf16.msk.msra.mxu1 %vm2506_vm3, %v2693_v5  ;;  %vm2216_vm3 = vcmp.eq.s32.totalorder %v2847_v24, 3 }
 0x404   :  { %2508 = vmatprep.subr.bf16.mxu1 %v2690_v35 }
 0x406   :  { %2396 = vmatmul.mubr.msk.f32.vlgmr.msra.gmra.mrb[2].mxu1 %vm211_vm9, %v2953_v6 }
 0x407   :  { %2407 = vmatprep.mubr.msk.f32.mxu1 %vm2691_vm8, %v2692_v36  ;;  %2510 = vmatpush3.bf16.msra.mxu1 %v2966_v10 }
 0x408   :  { %2514 = vmatprep.subr.bf16.mxu1 %v2690_v35 }
 0x4d9   :  { %v483_v15 = vpop.f32.mrb[2].mxu1 }
 0x4da   :  { %v487_v16 = vsub.f32 %v483_v15, %v2910_v57  ;;  %v2397_v17 = vpop.f32.mrb[3].mxu1  ;;  %2399 = vmatpush3.msra.mxu0 %v483_v15  ;;  %v1184_v57 = vmul.f32 %v2611_v20, %v2902_v52  ;;  %v64_v52 = vld [vmem:[#allocation2] sm:$0x1] }
 0x4db   :  { %2401 = vmatmul.mubr.msk.f32.vlgmr.msra.gmra.mrb[4].mxu0 %vm70_vm2, %v2974_v13  ;;  %2511 = vmatprep.subr.bf16.mxu0 %v2690_v35  ;;  %2544 = vpush %v64_v52 }
 0x4dc   :  { %v488_v21 = vmul.f32 %v487_v16, %v487_v16  ;;  %2513 = vmatpush3.bf16.msra.mxu0 %v2966_v10  ;;  %2414 = vmatprep.mubr.msk.f32.mxu0 %vm2691_vm8, %v2692_v36 }
 0x4dd   :  { %2517 = vmatprep.subr.bf16.mxu0 %v2690_v35 }
 0x4de   :  { %v489_v22 = vsel %vm211_vm9, %v488_v21, 0.0 }
 0x4df   :  { %2415 = vmatmul.mubr.msk.f32.vlgmr.msra.gmra.mrb[6].mxu0 %vm211_vm9, %v2792_v1  ;;  %490 = vadd.xlane.f32.xlu0 %v489_v22 }
 0x4e0   :  { %2519 = vmatpush3.bf16.msra.mxu0 %v2966_v10  ;;  %2428 = vmatprep.mubr.msk.f32.mxu0 %vm2691_vm8, %v2692_v36 }
 0x4e1   :  { %2438 = vmatprep.subr.msk.mxu0 %vm125_vm7, %v1184_v57 }
 0x4e3   :  { %2429 = vmatmul.mubr.msk.f32.vlgmr.msra.gmra.mrb[8].mxu0 %vm211_vm9, %v923_v25 }
 0x4e4   :  { %2439 = vmatpush3.msk.msra.mxu0 %vm125_vm7, %v1184_v57  ;;  %2440 = vmatprep.mubr.msk.f32.mxu0 %vm118_vm1, %v2807_v8  ;;  %v78_v8 = vld [vmem:[%s3268_s1] sm:$0xf]  ;;  %vm658_vm7 = vcmask 122880  }
 0x4e5   :  { %v1100_v37 = vsel %vm79_vm0, %v78_v8, 0.0 }
 0x4e6   :  { %1101 = vadd.xlane.f32.xlu1 %v1100_v37 }
 0x4e7   :  { %2441 = vmatmul.mubr.msk.f32.vlgmr.msra.gmra.mrb[10].mxu0 %vm118_vm1, %v2864_v34  ;;  %v610_v34 = vrot.slane %v2796_v2, 4  ;;  %vm686_vm1 = vcmask 124928  }
 0x4e8   :  { %2452 = vmatprep.mubr.msk.f32.mxu0 %vm70_vm2, %v2820_v12 }
 0x4e9   :  { %v611_v12 = vadd.f32 %v610_v34, %v2796_v2 }
 0x4eb   :  { %v612_v40 = vrot.slane %v611_v12, 2 }
 0x4ed   :  { %v613_v41 = vadd.f32 %v612_v40, %v611_v12 }
 0x4ef   :  { %v614_v42 = vrot.slane %v613_v41, 1 }
 0x4f1   :  { %v615_v43 = vadd.f32 %v614_v42, %v613_v41 }
 0x4f3   :  { %v616_v44 = vmul.f32 0.25, %v615_v43 }
 0x4f5   :  { %v617_v23 = vsub.f32 %v2792_v1, %v616_v44 }
 0x4f7   :  { %v627_v62 = vmul.f32 %v617_v23, %v617_v23 }
 0x4f9   :  { %v628_v21 = vsel %vm79_vm0, %v627_v62, 0.0 }
 0x56c   :  { %v491_v26 = vpop.xlane.xlu0 %490 }
 0x56d   :  { %v492_v27 = vrot.slane %v491_v26, 4 }
 0x56f   :  { %v493_v28 = vadd.f32 %v492_v27, %v491_v26 }
 0x571   :  { %v494_v30 = vrot.slane %v493_v28, 2 }
 0x573   :  { %v495_v31 = vadd.f32 %v494_v30, %v493_v28  ;;  %v629_v28 = vrot.slane %v628_v21, 4 }
 0x575   :  { %v496_v32 = vrot.slane %v495_v31, 1 }
 0x577   :  { %v497_v33 = vadd.f32 %v496_v32, %v495_v31 }
 0x579   :  { %2546 = vpush %v497_v33 }
 0x5ae   :  { %v577_v53 = vpop.f32.mrb[4].mxu0 }
 0x5af   :  { %v578_v54 = vadd.f32 %v577_v53, %v3008_v50  ;;  %v2402_v56 = vpop.f32.mrb[5].mxu0 }
 0x5b1   :  { %v581_v58 = vmul.f32 %v578_v54, %v2850_v29 }
 0x5b2   :  { %v3013_v59 = vpop.f32.mrb[6].mxu0 }
 0x5b3   :  { %v582_v2 = vadd.f32 %v581_v58, %v2799_v4  ;;  %v2416_v61 = vpop.f32.mrb[7].mxu0  ;;  %v3020_v63 = vmul.f32 %v3013_v59, %v3013_v59 }
 0x5b5   :  { %583 = vst.msk [vmem:[#allocation3] sm:$0xf] %vm79_vm0, %v582_v2  ;;  %2408 = vmatmul.mubr.msk.f32.vlgmr.msra.gmra.mrb[4].mxu1 %vm211_vm9, %v582_v2  ;;  %v600_v0 = vsel %vm79_vm0, %v582_v2, 0.0  ;;  %v584_v29 = vsub.f32 %v582_v2, %v2792_v1  ;;  %v674_v4 = vrot.slane %v582_v2, 7  ;;  %v848_v17 = vmul.f32 %v582_v2, %v582_v2 }
 0x5b6   :  { %2516 = vmatpush3.bf16.msra.mxu1 %v2966_v10  ;;  %v3026_v7 = vpop.f32.mrb[8].mxu0  ;;  %v601_v9 = vrot.slane %v600_v0, 4  ;;  %1117 = vadd.xlane.f32.xlu0 %v600_v0  ;;  %v998_v32 = vmul.f32 %v582_v2, %v2792_v1 }
 0x5b7   :  { %v997_v15 = vsub.f32 %v3026_v7, %v3020_v63  ;;  %v2430_v16 = vpop.f32.mrb[9].mxu0  ;;  %2421 = vmatprep.mubr.msk.f32.mxu1 %vm2691_vm8, %v2692_v36  ;;  %2520 = vmatprep.subr.bf16.mxu1 %v2690_v35  ;;  %v585_v20 = vmul.f32 %v584_v29, %v584_v29  ;;  %v676_v57 = vsub.f32 %v582_v2, %v674_v4 }
 0x5b8   :  { %v602_v22 = vadd.f32 %v601_v9, %v600_v0 }
 0x5b9   :  { %2422 = vmatmul.mubr.msk.f32.vlgmr.msra.gmra.mrb[6].mxu1 %vm211_vm9, %v848_v17  ;;  %v586_v25 = vsel %vm79_vm0, %v585_v20, 0.0  ;;  %v681_v27 = vsub.f32 %v676_v57, %v680_v11 }
 0x5ba   :  { %v603_v52 = vrot.slane %v602_v22, 2  ;;  %2522 = vmatpush3.bf16.msra.mxu1 %v2966_v10  ;;  %v2442_v26 = vpop.f32.mrb[10].mxu0  ;;  %587 = vadd.xlane.f32.xlu0 %v586_v25 }
 0x5bb   :  { %v1263_v30 = vadd.f32 %v2442_v26, %v2880_v39  ;;  %v1257_v31 = vpop.f32.mrb[11].mxu0  ;;  %2435 = vmatprep.mubr.msk.f32.mxu1 %vm2691_vm8, %v2692_v36  ;;  %2523 = vmatprep.subr.bf16.mxu1 %v2690_v35  ;;  %v682_v37 = vmul.f32 %v681_v27, %v681_v27  ;;  %v630_v39 = vadd.f32 %v629_v28, %v628_v21 }
 0x5bc   :  { %v604_v33 = vadd.f32 %v603_v52, %v602_v22  ;;  %v1258_v8 = vadd.f32 %v1257_v31, %v2878_v38 }
 0x5bd   :  { %v1267_v34 = vmax.f32 %v1263_v30, 0.0  ;;  %2436 = vmatmul.mubr.msk.f32.vlgmr.msra.gmra.mrb[8].mxu1 %vm211_vm9, %v998_v32  ;;  %v684_v41 = vrot.slane %v682_v37, 1  ;;  %v631_v38 = vrot.slane %v630_v39, 2 }
 0x5be   :  { %v605_v12 = vrot.slane %v604_v33, 1  ;;  %v1266_v40 = vmax.f32 %v1258_v8, 0.0  ;;  %2447 = vmatprep.mubr.msk.f32.mxu1 %vm2691_vm8, %v2692_v36 }
 0x5bf   :  { %v687_v1 = vsel %vm686_vm1, %v684_v41, 0.0  ;;  %v632_v58 = vadd.f32 %v631_v38, %v630_v39  ;;  %v3059_v39 = vld [vmem:[%s3277_s10] sm:$0xf]  ;;  %s3086_s10 = spop %2544 }
 0x5c0   :  { %v606_v42 = vadd.f32 %v605_v12, %v604_v33  ;;  %v2524_v43 = vpack.c.bf16 %v1267_v34, %v1266_v40  ;;  %688 = vadd.xlane.f32.xlu0 %v687_v1  ;;  %v1102_v40 = vpop.xlane.xlu1 %1101  ;;  %s3088_s20 = spop %2546 }
 0x5c1   :  { %v633_v62 = vrot.slane %v632_v58, 1  ;;  %v1103_v41 = vmul.f32 0.0625, %v1102_v40 }
 0x5c2   :  { %v608_v44 = vmul.f32 0.25, %v606_v42  ;;  %2525 = vmatpush3.bf16.msra.mxu1 %v2524_v43 }
 0x5c3   :  { %2526 = vmatprep.subr.bf16.mxu1 %v2690_v35  ;;  %v634_v9 = vadd.f32 %v633_v62, %v632_v58  ;;  %v1104_v42 = vmul.f32 %v1103_v41, %v3059_v39 }
 0x5c4   :  { %v609_v53 = vsub.f32 %v582_v2, %v608_v44 }
 0x5c5   :  { %2448 = vmatmul.mubr.msk.f32.vlgmr.msra.gmra.mrb[10].mxu1 %vm211_vm9, %v2887_v47  ;;  %v635_v16 = vmax.f32 %v634_v9, 1e-08  ;;  %v1106_v43 = vsel %vm1105_vm10, %v1104_v42, 0.0 }
 0x5c6   :  { %v618_v54 = vmul.f32 %v609_v53, %v609_v53  ;;  %v636_v56 = vmul.f32 %v617_v23, %v609_v53  ;;  %2459 = vmatprep.mubr.msk.f32.mxu1 %vm2691_vm8, %v2692_v36  ;;  %1107 = vadd.xlane.f32.xlu1 %v1106_v43 }
 0x5c8   :  { %v619_v60 = vsel %vm79_vm0, %v618_v54, 0.0  ;;  %v637_v47 = vsel %vm79_vm0, %v636_v56, 0.0 }
 0x5c9   :  { %v620_v61 = vrot.slane %v619_v60, 4  ;;  %v638_v23 = vrot.slane %v637_v47, 4 }
 0x5cb   :  { %v621_v0 = vadd.f32 %v620_v61, %v619_v60  ;;  %v639_v22 = vadd.f32 %v638_v23, %v637_v47 }
 0x5cd   :  { %v622_v29 = vrot.slane %v621_v0, 2  ;;  %v640_v26 = vrot.slane %v639_v22, 2 }
 0x5cf   :  { %v623_v4 = vadd.f32 %v622_v29, %v621_v0  ;;  %v641_v30 = vadd.f32 %v640_v26, %v639_v22 }
 0x5d1   :  { %v624_v11 = vrot.slane %v623_v4, 1  ;;  %v642_v31 = vrot.slane %v641_v30, 1 }
 0x5d3   :  { %v625_v2 = vadd.f32 %v624_v11, %v623_v4  ;;  %v643_v32 = vadd.f32 %v642_v31, %v641_v30 }
 0x5d5   :  { %v626_v17 = vmax.f32 %v625_v2, 1e-08 }
 0x5d7   :  { %v644_v20 = vmul.f32 %v635_v16, %v626_v17 }
 0x5d9   :  { %2612 = vrsqrt.f32 %v644_v20  ;;  %vm647_vm5 = vcmp.eq.f32.partialorder %v644_v20, inf  ;;  %v650_v25 = vand.u32 2147483648, %v644_v20  ;;  %vm649_vm6 = vcmp.eq.f32.partialorder %v644_v20, 0.0 }
 0x5e3   :  { %v2613_v21 = vpop.eup %2612 }
 0x5e4   :  { %v646_v57 = vmul.f32 %v2613_v21, %v644_v20 }
 0x5e6   :  { %v648_v52 = vsel %vm647_vm5, %v644_v20, %v646_v57 }
 0x5e7   :  { %v651_v27 = vsel %vm649_vm6, %v650_v25, %v648_v52 }
 0x5e8   :  { %v652_v28 = vadd.f32 1e-08, %v651_v27 }
 0x5ea   :  { %2614 = vrcp.f32 %v652_v28 }
 0x5f4   :  { %v2615_v33 = vpop.eup %2614 }
 0x5f5   :  { %v654_v8 = vmul.f32 %v2615_v33, %v643_v32 }
 0x5f7   :  { %v2289_v37 = vclamps-f32 %v654_v8, 1.0 }
 0x5f9   :  { %v657_v34 = vsub.f32 1.0, %v2289_v37 }
 0x5fb   :  { %v659_v12 = vsel %vm658_vm7, %v657_v34, 0.0 }
 0x5fc   :  { %660 = vadd.xlane.f32.xlu0 %v659_v12 }
 0x643   :  { %v1118_v1 = vpop.xlane.xlu0 %1117 }
 0x647   :  { %v588_v44 = vpop.xlane.xlu0 %587 }
 0x648   :  { %v589_v38 = vrot.slane %v588_v44, 4 }
 0x64a   :  { %v590_v53 = vadd.f32 %v589_v38, %v588_v44  ;;  %v1119_v38 = vmul.f32 0.0625, %v1118_v1 }
 0x64c   :  { %v591_v54 = vrot.slane %v590_v53, 2 }
 0x64d   :  { %v689_v61 = vpop.xlane.xlu0 %688 }
 0x64e   :  { %v592_v56 = vadd.f32 %v591_v54, %v590_v53  ;;  %v690_v62 = vrot.slane %v689_v61, 4 }
 0x650   :  { %v593_v58 = vrot.slane %v592_v56, 1  ;;  %v691_v0 = vadd.f32 %v690_v62, %v689_v61 }
 0x652   :  { %v594_v60 = vadd.f32 %v593_v58, %v592_v56  ;;  %v692_v29 = vrot.slane %v691_v0, 2  ;;  %v1120_v56 = vmul.f32 %v1119_v38, %v3059_v39 }
 0x654   :  { %2548 = vpush %v594_v60  ;;  %v693_v21 = vadd.f32 %v692_v29, %v691_v0  ;;  %v1121_v58 = vsel %vm1105_vm10, %v1120_v56, 0.0  ;;  %v1108_v60 = vpop.xlane.xlu1 %1107 }
 0x655   :  { %v1109_v61 = vrot.slane %v1108_v60, 4 }
 0x656   :  { %v694_v28 = vrot.slane %v693_v21, 1 }
 0x658   :  { %v695_v42 = vadd.f32 %v694_v28, %v693_v21 }
 0x685   :  { %s3090_s6 = spop %2548 }
 0x688   :  { %v769_v9 = vpop.f32.mrb[4].mxu1 }
 0x689   :  { %v845_v4 = vmul.f32 %v769_v9, %v769_v9  ;;  %v847_v11 = vmul.f32 %v3013_v59, %v769_v9  ;;  %v661_v16 = vpop.xlane.xlu0 %660  ;;  %v2409_v2 = vpop.f32.mrb[5].mxu1 }
 0x68a   :  { %v662_v17 = vrot.slane %v661_v16, 4 }
 0x68b   :  { %v1078_v20 = vadd.f32 %v3020_v63, %v845_v4  ;;  %v1073_v30 = vmul.f32 2.0, %v847_v11 }
 0x68c   :  { %v663_v47 = vadd.f32 %v662_v17, %v661_v16  ;;  %v918_v23 = vpop.f32.mrb[6].mxu1 }
 0x68d   :  { %v922_v22 = vsub.f32 %v918_v23, %v845_v4  ;;  %v2423_v57 = vpop.f32.mrb[7].mxu1  ;;  %v1079_v59 = vadd.f32 0.0001, %v1078_v20  ;;  %v1074_v40 = vadd.f32 0.0001, %v1073_v30 }
 0x68e   :  { %v664_v25 = vrot.slane %v663_v47, 2 }
 0x68f   :  { %v1080_v52 = vadd.f32 %v997_v15, %v922_v22 }
 0x690   :  { %v1068_v26 = vpop.f32.mrb[8].mxu1  ;;  %v665_v27 = vadd.f32 %v664_v25, %v663_v47 }
 0x691   :  { %v1081_v31 = vadd.f32 0.0009, %v1080_v52  ;;  %v1072_v32 = vsub.f32 %v1068_v26, %v847_v11  ;;  %v2437_v33 = vpop.f32.mrb[9].mxu1 }
 0x692   :  { %v666_v8 = vrot.slane %v665_v27, 1 }
 0x693   :  { %v1082_v37 = vmul.f32 %v1081_v31, %v1079_v59  ;;  %v1075_v34 = vmul.f32 2.0, %v1072_v32 }
 0x694   :  { %v667_v12 = vadd.f32 %v666_v8, %v665_v27 }
 0x695   :  { %2616 = vrcp.f32 %v1082_v37  ;;  %v1076_v41 = vadd.f32 0.0009, %v1075_v34 }
 0x696   :  { %2550 = vpush %v667_v12 }
 0x697   :  { %v1077_v43 = vmul.f32 %v1076_v41, %v1074_v40  ;;  %2552 = vpush %v695_v42 }
 0x698   :  { %v1334_v63 = vpop.f32.mrb[10].mxu1 }
 0x699   :  { %v3069_v7 = vadd.f32 %v1334_v63, %v2907_v55  ;;  %v2449_v15 = vpop.f32.mrb[11].mxu1 }
 0x69b   :  { %1339 = vst.msk [vmem:[#allocation5 + $0x8] sm:$0xff] %vm211_vm9, %v3069_v7  ;;  %2450 = vmatprep.subr.mxu0 %v3069_v7  ;;  %v1415_v26 = vmul.f32 %v3069_v7, %v3069_v7 }
 0x69c   :  { %2451 = vmatpush3.msra.mxu0 %v3069_v7 }
 0x69d   :  { %2453 = vmatmul.mubr.msk.f32.vlgmr.msra.gmra.mrb[12].mxu0 %vm70_vm2, %v2827_v14  ;;  %2462 = vmatprep.subr.mxu0 %v2692_v36  ;;  %v1110_v14 = vadd.f32 %v1109_v61, %v1108_v60  ;;  %v1416_v27 = vsel %vm211_vm9, %v1415_v26, 0.0 }
 0x69e   :  { %2464 = vmatprep.mubr.msk.f32.mxu0 %vm2691_vm8, %v2692_v36  ;;  %v1417_v28 = vrot.slane %v1416_v27, 4 }
 0x69f   :  { %v2617_v44 = vpop.eup %2616  ;;  %v1111_v62 = vrot.slane %v1110_v14, 2 }
 0x6a0   :  { %v1084_v55 = vmul.f32 %v2617_v44, %v1077_v43  ;;  %v1418_v30 = vadd.f32 %v1417_v28, %v1416_v27 }
 0x6a1   :  { %v1112_v9 = vadd.f32 %v1111_v62, %v1110_v14 }
 0x6a2   :  { %v1085_v53 = vsub.f32 1.0, %v1084_v55  ;;  %v1419_v59 = vrot.slane %v1418_v30, 2 }
 0x6a3   :  { %v1113_v2 = vrot.slane %v1112_v9, 1 }
 0x6a4   :  { %v1086_v54 = vsel %vm79_vm0, %v1085_v53, 0.0  ;;  %v1420_v31 = vadd.f32 %v1419_v59, %v1418_v30 }
 0x6a5   :  { %1087 = vadd.xlane.f32.xlu0 %v1086_v54  ;;  %v1114_v21 = vadd.f32 %v1113_v2, %v1112_v9 }
 0x6a6   :  { %v1421_v32 = vrot.slane %v1420_v31, 1 }
 0x6a8   :  { %v1422_v12 = vadd.f32 %v1421_v32, %v1420_v31 }
 0x6a9   :  { %1122 = vadd.xlane.f32.xlu0 %v1121_v58 }
 0x6c7   :  { %s3092_s21 = spop %2550 }
 0x6c8   :  { %s3094_s9 = spop %2552 }
 0x732   :  { %v1088_v0 = vpop.xlane.xlu0 %1087 }
 0x733   :  { %v1089_v29 = vrot.slane %v1088_v0, 4 }
 0x735   :  { %v1090_v4 = vadd.f32 %v1089_v29, %v1088_v0 }
 0x736   :  { %v1123_v11 = vpop.xlane.xlu0 %1122 }
 0x737   :  { %v1091_v1 = vrot.slane %v1090_v4, 2  ;;  %v1124_v16 = vrot.slane %v1123_v11, 4 }
 0x739   :  { %v1125_v17 = vadd.f32 %v1124_v16, %v1123_v11  ;;  %v1092_v20 = vadd.f32 %v1091_v1, %v1090_v4 }
 0x73b   :  { %v1126_v47 = vrot.slane %v1125_v17, 2  ;;  %v1093_v23 = vrot.slane %v1092_v20, 1 }
 0x73d   :  { %v1094_v22 = vadd.f32 %v1093_v23, %v1092_v20  ;;  %v1127_v57 = vadd.f32 %v1126_v47, %v1125_v17  ;;  %v2296_v47 = vld [vmem:[%s3268_s1 + $0x4] sm:$0xf] }
 0x73e   :  { %v2130_v23 = vsel %vm79_vm0, %v2296_v47, 0.0 }
 0x73f   :  { %2554 = vpush %v1094_v22  ;;  %v1128_v25 = vrot.slane %v1127_v57, 1  ;;  %2131 = vadd.xlane.f32.xlu1 %v2130_v23 }
 0x740   :  { %2556 = vpush %v1114_v21 }
 0x741   :  { %v1129_v52 = vadd.f32 %v1128_v25, %v1127_v57 }
 0x743   :  { %2558 = vpush %v1129_v52 }
 0x770   :  { %s3096_s22 = spop %2554  ;;  %v2454_v33 = vpop.f32.mrb[12].mxu0 }
 0x771   :  { %s2557_s23 = spop %2556  ;;  %v1424_v8 = vmul.f32 2.0, %v2454_v33  ;;  %v1406_v37 = vpop.f32.mrb[13].mxu0 }
 0x772   :  { %s1116_s24 = sadd.f32 %s2557_s23, %s3086_s10  ;;  %v1423_v34 = vmul.f32 2.0, %v1406_v37 }
 0x773   :  { %v1426_v40 = vsub.f32 %v2896_v49, %v1424_v8 }
 0x774   :  { %s3100_s2 = ssub.f32 0.0, %s1116_s24  ;;  %v1425_v41 = vsub.f32 %v2894_v48, %v1423_v34  ;;  %s2559_s27 = spop %2558  ;;  %v1642_v34 = vrot.slane %v2840_v19, 4 }
 0x775   :  { %v1428_v42 = vadd.f32 %v1426_v40, %v1422_v12  ;;  %s3121_s4 = sadd.f32 %s2559_s27, %s3086_s10  ;;  %s671_s27 = smul.f32 0.0625, %s3092_s21 }
 0x776   :  { %s1134_s11 = sand.u32 2147483647, %s3100_s2  ;;  %v1427_v43 = vadd.f32 %v1425_v41, %v1422_v12  ;;  %s1133_s7 = smax.f32 %s2694_s17, %s3100_s2  ;;  %v1643_v12 = vadd.f32 %v1642_v34, %v2840_v19 }
 0x777   :  { %s1135_s26 = ssub.f32 0.0, %s1134_s11  ;;  %v1430_v63 = vsel %vm211_vm9, %v1428_v42, inf  ;;  %s1147_s5 = sand.u32 2147483647, %s3121_s4 }
 0x778   :  { %v1429_v15 = vsel %vm211_vm9, %v1427_v43, inf  ;;  %s1148_s15 = ssub.f32 0.0, %s1147_s5  ;;  %s1146_s3 = smax.f32 %s2694_s17, %s3121_s4  ;;  %v1644_v40 = vrot.slane %v1643_v12, 2 }
 0x779   :  { %v1136_v44 = vstv %s1135_s26  ;;  %v1431_v38 = vmin.f32 %v1429_v15, %v1430_v63 }
 0x77a   :  { %v1137_v55 = vmul.f32 1.442695, %v1136_v44  ;;  %v1645_v41 = vadd.f32 %v1644_v40, %v1643_v12 }
 0x77b   :  { %v1432_v53 = vrot.slane %v1431_v38, 4 }
 0x77c   :  { %2618 = vpow2.f32 %v1137_v55 }
 0x77d   :  { %v1433_v54 = vmin.f32 %v1431_v38, %v1432_v53  ;;  %v2640_v38 = vld [vmem:[%s3286_s25 + $0x4] sm:$0xf] }
 0x77f   :  { %v1434_v49 = vrot.slane %v1433_v54, 2 }
 0x781   :  { %v1435_v56 = vmin.f32 %v1433_v54, %v1434_v49  ;;  %v1709_v54 = vrot.slane %v2640_v38, 7 }
 0x783   :  { %v1436_v58 = vrot.slane %v1435_v56, 1 }
 0x785   :  { %v1437_v60 = vmin.f32 %v1435_v56, %v1436_v58 }
 0x786   :  { %v2619_v61 = vpop.eup %2618 }
 0x787   :  { %vm1438_vm11 = vcmp.le.f32.partialorder %v1427_v43, %v1437_v60  ;;  %vm1439_vm12 = vcmp.le.f32.partialorder %v1428_v42, %v1437_v60  ;;  %2560 = vpush %v2619_v61  ;;  %v1646_v42 = vrot.slane %v1645_v41, 1  ;;  %v1711_v61 = vsub.f32 %v2640_v38, %v1709_v54 }
 0x788   :  { %v1440_v48 = vsel %vm1438_vm11, %v2939_v45, 16.0  ;;  %v1441_v14 = vsel %vm1439_vm12, %v2941_v46, 16.0 }
 0x789   :  { %v1442_v62 = vsel %vm211_vm9, %v1440_v48, inf  ;;  %v1443_v0 = vsel %vm211_vm9, %v1441_v14, inf }
 0x78a   :  { %v1444_v29 = vmin.f32 %v1442_v62, %v1443_v0 }
 0x78c   :  { %v1445_v9 = vrot.slane %v1444_v29, 4 }
 0x78e   :  { %v1446_v4 = vmin.f32 %v1444_v29, %v1445_v9 }
 0x790   :  { %v1447_v11 = vrot.slane %v1446_v4, 2 }
 0x792   :  { %v1448_v1 = vmin.f32 %v1446_v4, %v1447_v11 }
 0x794   :  { %v1449_v16 = vrot.slane %v1448_v1, 1 }
 0x796   :  { %v1450_v2 = vmin.f32 %v1448_v1, %v1449_v16 }
 0x798   :  { %vm1451_vm13 = vcmp.eq.f32.partialorder %v2939_v45, %v1450_v2  ;;  %vm1452_vm14 = vcmp.eq.f32.partialorder %v2941_v46, %v1450_v2  ;;  %v1149_v45 = vstv %s1148_s15 }
 0x799   :  { %vm2527_vm15 = vmpackc.low %vm1452_vm14, %vm1451_vm13  ;;  %v1150_v46 = vmul.f32 1.442695, %v1149_v45 }
 0x79a   :  { %2528 = vmatpush3.bf16.msk.msra.mxu1 %vm2527_vm15, %v2693_v5 }
 0x79b   :  { %2529 = vmatprep.subr.bf16.mxu1 %v2690_v35 }
 0x79d   :  { %2460 = vmatmul.mubr.msk.f32.vlgmr.msra.gmra.mrb[12].mxu1 %vm211_vm9, %v2953_v6 }
 0x79e   :  { %2531 = vmatpush3.bf16.msra.mxu1 %v2966_v10  ;;  %2471 = vmatprep.mubr.msk.f32.mxu1 %vm2691_vm8, %v2692_v36 }
 0x79f   :  { %2535 = vmatprep.subr.bf16.mxu1 %v2690_v35 }
 0x7b8   :  { %s2561_s28 = spop %2560 }
 0x7b9   :  { %s1140_s29 = sadd.f32 1.0, %s2561_s28  ;;  %s598_s28 = smul.f32 0.015625, %s3090_s6 }
 0x7bb   :  { %v1141_v5 = vstv %s1140_s29 }
 0x7bc   :  { %2620 = vlog2.f32 %v1141_v5 }
 0x7bd   :  { %2622 = vpow2.f32 %v1150_v46 }
 0x7c6   :  { %v2621_v6 = vpop.eup %2620 }
 0x7c7   :  { %v1143_v17 = vmul.f32 0.6931472, %v2621_v6  ;;  %v2623_v20 = vpop.eup %2622 }
 0x7c9   :  { %2562 = vpush %v1143_v17 }
 0x7ca   :  { %2564 = vpush %v2623_v20 }
 0x7fa   :  { %s2563_s18 = spop %2562 }
 0x7fb   :  { %s1145_s8 = sadd.f32 %s2563_s18, %s1133_s7  ;;  %s2565_s12 = spop %2564 }
 0x7fc   :  { %s1153_s19 = sadd.f32 1.0, %s2565_s12  ;;  %s699_s18 = smul.f32 0.020833334, %s3094_s9 }
 0x7fe   :  { %v1154_v21 = vstv %s1153_s19 }
 0x7ff   :  { %2624 = vlog2.f32 %v1154_v21 }
 0x809   :  { %v2625_v22 = vpop.eup %2624 }
 0x80a   :  { %v1156_v57 = vmul.f32 0.6931472, %v2625_v22 }
 0x80c   :  { %2566 = vpush %v1156_v57 }
 0x83d   :  { %s2567_s23 = spop %2566 }
 0x83e   :  { %s1158_s24 = sadd.f32 %s2567_s23, %s1146_s3  ;;  %s1098_s3 = smul.f32 0.015625, %s3096_s22 }
 0x840   :  { %s3132_s1 = sadd.f32 %s1158_s24, %s1145_s8 }
 0x870   :  { %v1523_v25 = vpop.f32.mrb[12].mxu1 }
 0x871   :  { %v1527_v52 = vsub.f32 %v1523_v25, %v3069_v7  ;;  %v2461_v26 = vpop.f32.mrb[13].mxu1  ;;  %2463 = vmatpush3.msra.mxu0 %v1523_v25  ;;  %v3151_v7 = vpop.xlane.xlu1 %2131 }
 0x872   :  { %2465 = vmatmul.mubr.msk.f32.vlgmr.msra.gmra.mrb[14].mxu0 %vm70_vm2, %v2974_v13  ;;  %2532 = vmatprep.subr.bf16.mxu0 %v2690_v35  ;;  %v1953_v13 = vmul.f32 %v2836_v18, %v2836_v18 }
 0x873   :  { %v1528_v27 = vmul.f32 %v1527_v52, %v1527_v52  ;;  %2534 = vmatpush3.bf16.msra.mxu0 %v2966_v10  ;;  %2478 = vmatprep.mubr.msk.f32.mxu0 %vm2691_vm8, %v2692_v36 }
 0x874   :  { %2538 = vmatprep.subr.bf16.mxu0 %v2690_v35 }
 0x875   :  { %v1529_v28 = vsel %vm211_vm9, %v1528_v27, 0.0 }
 0x876   :  { %1530 = vadd.xlane.f32.xlu1 %v1529_v28  ;;  %2479 = vmatmul.mubr.msk.f32.vlgmr.msra.gmra.mrb[16].mxu0 %vm211_vm9, %v2836_v18  ;;  %v1647_v18 = vadd.f32 %v1646_v42, %v1645_v41 }
 0x877   :  { %2540 = vmatpush3.bf16.msra.mxu0 %v2966_v10  ;;  %2492 = vmatprep.mubr.msk.f32.mxu0 %vm2691_vm8, %v2692_v36 }
 0x878   :  { %v1648_v43 = vmul.f32 0.25, %v1647_v18 }
 0x87a   :  { %2493 = vmatmul.mubr.msk.f32.vlgmr.msra.gmra.mrb[18].mxu0 %vm211_vm9, %v1953_v13  ;;  %v1649_v55 = vsub.f32 %v2640_v38, %v1648_v43 }
 0x87c   :  { %v1659_v19 = vmul.f32 %v1649_v55, %v1649_v55 }
 0x87e   :  { %v1660_v48 = vsel %vm79_vm0, %v1659_v19, 0.0 }
 0x87f   :  { %v1661_v4 = vrot.slane %v1660_v48, 4 }
 0x881   :  { %v1662_v45 = vadd.f32 %v1661_v4, %v1660_v48 }
 0x903   :  { %v1531_v30 = vpop.xlane.xlu1 %1530 }
 0x904   :  { %v1532_v59 = vrot.slane %v1531_v30, 4 }
 0x906   :  { %v1533_v31 = vadd.f32 %v1532_v59, %v1531_v30 }
 0x908   :  { %v1534_v32 = vrot.slane %v1533_v31, 2 }
 0x90a   :  { %v1535_v33 = vadd.f32 %v1534_v32, %v1533_v31 }
 0x90c   :  { %v1536_v8 = vrot.slane %v1535_v33, 1 }
 0x90e   :  { %v1537_v37 = vadd.f32 %v1536_v8, %v1535_v33 }
 0x910   :  { %2568 = vpush %v1537_v37 }
 0x941   :  { %s3185_s25 = spop %2568 }
 0x945   :  { %v1609_v63 = vpop.f32.mrb[14].mxu0 }
 0x946   :  { %v1610_v15 = vadd.f32 %v1609_v63, %v3008_v50  ;;  %v2466_v44 = vpop.f32.mrb[15].mxu0 }
 0x948   :  { %v1613_v53 = vmul.f32 %v1610_v15, %v2921_v3 }
 0x949   :  { %v1871_v54 = vpop.f32.mrb[16].mxu0 }
 0x94a   :  { %v1614_v49 = vadd.f32 %v1613_v53, %v2898_v51  ;;  %v1876_v19 = vmul.f32 %v1871_v54, %v1871_v54 }
 0x94c   :  { %1616 = vst.msk [vmem:[#allocation3 + $0x4] sm:$0xf] %vm79_vm0, %v1614_v49  ;;  %2472 = vmatmul.mubr.msk.f32.vlgmr.msra.gmra.mrb[14].mxu1 %vm211_vm9, %v1614_v49  ;;  %v1633_v56 = vsel %vm79_vm0, %v1614_v49, 0.0  ;;  %v1617_v58 = vsub.f32 %v1614_v49, %v2640_v38  ;;  %v1705_v60 = vrot.slane %v1614_v49, 7  ;;  %v1878_v3 = vmul.f32 %v1614_v49, %v1614_v49 }
 0x94d   :  { %2537 = vmatpush3.bf16.msra.mxu1 %v2966_v10  ;;  %2146 = vadd.xlane.f32.xlu0 %v1633_v56  ;;  %v1634_v50 = vrot.slane %v1633_v56, 4  ;;  %v2028_v11 = vmul.f32 %v2640_v38, %v1614_v49 }
 0x94e   :  { %2485 = vmatprep.mubr.msk.f32.mxu1 %vm2691_vm8, %v2692_v36  ;;  %2541 = vmatprep.subr.bf16.mxu1 %v2690_v35  ;;  %v1618_v51 = vmul.f32 %v1617_v58, %v1617_v58  ;;  %v1707_v62 = vsub.f32 %v1614_v49, %v1705_v60  ;;  %v2133_v60 = vmul.f32 0.0625, %v3151_v7 }
 0x94f   :  { %v1635_v14 = vadd.f32 %v1634_v50, %v1633_v56 }
 0x950   :  { %2486 = vmatmul.mubr.msk.f32.vlgmr.msra.gmra.mrb[16].mxu1 %vm211_vm9, %v1878_v3  ;;  %v1619_v0 = vsel %vm79_vm0, %v1618_v51, 0.0  ;;  %v1712_v9 = vsub.f32 %v1707_v62, %v1711_v61  ;;  %v2134_v61 = vmul.f32 %v2133_v60, %v3059_v39 }
 0x951   :  { %v1636_v29 = vrot.slane %v1635_v14, 2  ;;  %2543 = vmatpush3.bf16.msra.mxu1 %v2966_v10  ;;  %1620 = vadd.xlane.f32.xlu0 %v1619_v0  ;;  %v1663_v10 = vrot.slane %v1662_v45, 2 }
 0x952   :  { %2499 = vmatprep.mubr.msk.f32.mxu1 %vm2691_vm8, %v2692_v36  ;;  %v1713_v1 = vmul.f32 %v1712_v9, %v1712_v9  ;;  %v2135_v3 = vsel %vm1105_vm10, %v2134_v61, 0.0 }
 0x953   :  { %v1637_v35 = vadd.f32 %v1636_v29, %v1635_v14  ;;  %v1664_v23 = vadd.f32 %v1663_v10, %v1662_v45 }
 0x954   :  { %2500 = vmatmul.mubr.msk.f32.vlgmr.msra.gmra.mrb[18].mxu1 %vm211_vm9, %v2028_v11  ;;  %v1715_v2 = vrot.slane %v1713_v1, 1  ;;  %vm2212_vm9 = vcmp.eq.s32.totalorder %v2847_v24, 2 }
 0x955   :  { %v1638_v16 = vrot.slane %v1637_v35, 1  ;;  %v1665_v22 = vrot.slane %v1664_v23, 1 }
 0x956   :  { %v1717_v5 = vsel %vm686_vm1, %v1715_v2, 0.0 }
 0x957   :  { %v1639_v46 = vadd.f32 %v1638_v16, %v1637_v35  ;;  %1718 = vadd.xlane.f32.xlu0 %v1717_v5  ;;  %v1666_v52 = vadd.f32 %v1665_v22, %v1664_v23 }
 0x959   :  { %v1640_v6 = vmul.f32 0.25, %v1639_v46  ;;  %v1667_v28 = vmax.f32 %v1666_v52, 1e-08 }
 0x95b   :  { %v1641_v17 = vsub.f32 %v1614_v49, %v1640_v6  ;;  %v2480_v49 = vpop.f32.mrb[17].mxu0  ;;  %2136 = vadd.xlane.f32.xlu0 %v2135_v3 }
 0x95c   :  { %v2023_v56 = vpop.f32.mrb[18].mxu0 }
 0x95d   :  { %v1650_v20 = vmul.f32 %v1641_v17, %v1641_v17  ;;  %v1668_v47 = vmul.f32 %v1649_v55, %v1641_v17  ;;  %v2027_v58 = vsub.f32 %v2023_v56, %v1876_v19  ;;  %v2494_v50 = vpop.f32.mrb[19].mxu0 }
 0x95f   :  { %v1651_v36 = vsel %vm79_vm0, %v1650_v20, 0.0  ;;  %v1669_v31 = vsel %vm79_vm0, %v1668_v47, 0.0 }
 0x960   :  { %v1652_v21 = vrot.slane %v1651_v36, 4  ;;  %v1670_v32 = vrot.slane %v1669_v31, 4 }
 0x962   :  { %v1653_v57 = vadd.f32 %v1652_v21, %v1651_v36  ;;  %v1671_v8 = vadd.f32 %v1670_v32, %v1669_v31 }
 0x964   :  { %v1654_v25 = vrot.slane %v1653_v57, 2  ;;  %v1672_v40 = vrot.slane %v1671_v8, 2 }
 0x966   :  { %v1655_v26 = vadd.f32 %v1654_v25, %v1653_v57  ;;  %v1673_v18 = vadd.f32 %v1672_v40, %v1671_v8 }
 0x968   :  { %v1656_v27 = vrot.slane %v1655_v26, 1  ;;  %v1674_v43 = vrot.slane %v1673_v18, 1 }
 0x96a   :  { %v1657_v13 = vadd.f32 %v1656_v27, %v1655_v26  ;;  %v1675_v63 = vadd.f32 %v1674_v43, %v1673_v18 }
 0x96c   :  { %v1658_v30 = vmax.f32 %v1657_v13, 1e-08 }
 0x96e   :  { %v1676_v59 = vmul.f32 %v1667_v28, %v1658_v30 }
 0x970   :  { %2626 = vrsqrt.f32 %v1676_v59  ;;  %vm1679_vm2 = vcmp.eq.f32.partialorder %v1676_v59, inf  ;;  %v1682_v34 = vand.u32 2147483648, %v1676_v59  ;;  %vm1681_vm8 = vcmp.eq.f32.partialorder %v1676_v59, 0.0 }
 0x97a   :  { %v2627_v33 = vpop.eup %2626 }
 0x97b   :  { %v1678_v37 = vmul.f32 %v2627_v33, %v1676_v59 }
 0x97d   :  { %v1680_v12 = vsel %vm1679_vm2, %v1676_v59, %v1678_v37 }
 0x97e   :  { %v1683_v41 = vsel %vm1681_vm8, %v1682_v34, %v1680_v12 }
 0x97f   :  { %v1684_v42 = vadd.f32 1e-08, %v1683_v41 }
 0x981   :  { %2628 = vrcp.f32 %v1684_v42 }
 0x98b   :  { %v2629_v15 = vpop.eup %2628 }
 0x98c   :  { %v1686_v44 = vmul.f32 %v2629_v15, %v1675_v63 }
 0x98e   :  { %v2310_v38 = vclamps-f32 %v1686_v44, 1.0 }
 0x990   :  { %v1689_v55 = vsub.f32 1.0, %v2310_v38 }
 0x992   :  { %v1690_v53 = vsel %vm658_vm7, %v1689_v55, 0.0 }
 0x993   :  { %1691 = vadd.xlane.f32.xlu1 %v1690_v53 }
 0x9da   :  { %v2147_v51 = vpop.xlane.xlu0 %2146 }
 0x9db   :  { %v2148_v41 = vmul.f32 0.0625, %v2147_v51 }
 0x9dd   :  { %v2149_v63 = vmul.f32 %v2148_v41, %v3059_v39 }
 0x9de   :  { %v1621_v48 = vpop.xlane.xlu0 %1620 }
 0x9df   :  { %v1622_v14 = vrot.slane %v1621_v48, 4  ;;  %v2150_v15 = vsel %vm1105_vm10, %v2149_v63, 0.0 }
 0x9e1   :  { %v1623_v62 = vadd.f32 %v1622_v14, %v1621_v48 }
 0x9e3   :  { %v1624_v0 = vrot.slane %v1623_v62, 2 }
 0x9e4   :  { %v1719_v11 = vpop.xlane.xlu0 %1718 }
 0x9e5   :  { %v1625_v29 = vadd.f32 %v1624_v0, %v1623_v62  ;;  %v1720_v35 = vrot.slane %v1719_v11, 4 }
 0x9e7   :  { %v1626_v9 = vrot.slane %v1625_v29, 1  ;;  %v1721_v1 = vadd.f32 %v1720_v35, %v1719_v11 }
 0x9e8   :  { %v2137_v44 = vpop.xlane.xlu0 %2136 }
 0x9e9   :  { %v1627_v4 = vadd.f32 %v1626_v9, %v1625_v29  ;;  %v1722_v16 = vrot.slane %v1721_v1, 2  ;;  %v2138_v38 = vrot.slane %v2137_v44, 4 }
 0x9eb   :  { %2570 = vpush %v1627_v4  ;;  %v1723_v47 = vadd.f32 %v1722_v16, %v1721_v1  ;;  %v2139_v55 = vadd.f32 %v2138_v38, %v2137_v44 }
 0x9ed   :  { %v1724_v52 = vrot.slane %v1723_v47, 1  ;;  %v2140_v53 = vrot.slane %v2139_v55, 2 }
 0x9ef   :  { %v1725_v34 = vadd.f32 %v1724_v52, %v1723_v47 }
 0xa1c   :  { %s3187_s26 = spop %2570 }
 0xa1d   :  { %s1631_s21 = smul.f32 0.015625, %s3187_s26 }
 0xa1f   :  { %v1799_v2 = vpop.f32.mrb[14].mxu1  ;;  %s1632_s30 = sadd.f32 %s1631_s21, %s598_s28 }
 0xa20   :  { %v1875_v7 = vmul.f32 %v1799_v2, %v1799_v2  ;;  %v1877_v45 = vmul.f32 %v1871_v54, %v1799_v2  ;;  %v1692_v46 = vpop.xlane.xlu1 %1691  ;;  %v2473_v5 = vpop.f32.mrb[15].mxu1 }
 0xa21   :  { %v1693_v6 = vrot.slane %v1692_v46, 4  ;;  %s2190_s8 = smul.f32 0.5, %s1632_s30 }
 0xa22   :  { %v2108_v10 = vadd.f32 %v1876_v19, %v1875_v7  ;;  %v2103_v26 = vmul.f32 2.0, %v1877_v45  ;;  %v2141_v19 = vadd.f32 %v2140_v53, %v2139_v55 }
 0xa23   :  { %v1694_v17 = vadd.f32 %v1693_v6, %v1692_v46  ;;  %v1948_v20 = vpop.f32.mrb[16].mxu1  ;;  %s2196_s23 = smul.f32 0.1, %s2190_s8  ;;  %v2206_v11 = vstv %s2190_s8 }
 0xa24   :  { %v1952_v23 = vsub.f32 %v1948_v20, %v1875_v7  ;;  %v2487_v36 = vpop.f32.mrb[17].mxu1  ;;  %v2109_v27 = vadd.f32 0.0001, %v2108_v10  ;;  %v2104_v8 = vadd.f32 0.0001, %v2103_v26  ;;  %v2142_v3 = vrot.slane %v2141_v19, 1 }
 0xa25   :  { %v1695_v21 = vrot.slane %v1694_v17, 2  ;;  %v2207_v1 = vsel %vm104_vm4, %v2206_v11, 0.0 }
 0xa26   :  { %v2110_v22 = vadd.f32 %v2027_v58, %v1952_v23  ;;  %v2143_v0 = vadd.f32 %v2142_v3, %v2141_v19 }
 0xa27   :  { %v2098_v57 = vpop.f32.mrb[18].mxu1  ;;  %v1696_v25 = vadd.f32 %v1695_v21, %v1694_v17 }
 0xa28   :  { %v2111_v28 = vadd.f32 0.0009, %v2110_v22  ;;  %v2102_v13 = vsub.f32 %v2098_v57, %v1877_v45  ;;  %v2501_v30 = vpop.f32.mrb[19].mxu1 }
 0xa29   :  { %v1697_v59 = vrot.slane %v1696_v25, 1 }
 0xa2a   :  { %v2112_v31 = vmul.f32 %v2111_v28, %v2109_v27  ;;  %v2105_v32 = vmul.f32 2.0, %v2102_v13 }
 0xa2b   :  { %v1698_v33 = vadd.f32 %v1697_v59, %v1696_v25 }
 0xa2c   :  { %2630 = vrcp.f32 %v2112_v31  ;;  %v2106_v37 = vadd.f32 0.0009, %v2105_v32 }
 0xa2d   :  { %2572 = vpush %v1698_v33 }
 0xa2e   :  { %v2107_v12 = vmul.f32 %v2106_v37, %v2104_v8  ;;  %2574 = vpush %v1725_v34 }
 0xa36   :  { %v2631_v40 = vpop.eup %2630 }
 0xa37   :  { %v2114_v42 = vmul.f32 %v2631_v40, %v2107_v12 }
 0xa39   :  { %v2115_v18 = vsub.f32 1.0, %v2114_v42 }
 0xa3b   :  { %v2116_v43 = vsel %vm79_vm0, %v2115_v18, 0.0  ;;  %vm2208_vm0 = vcmp.eq.s32.totalorder %v2847_v24, 1 }
 0xa3c   :  { %2117 = vadd.xlane.f32.xlu1 %v2116_v43 }
 0xa40   :  { %2151 = vadd.xlane.f32.xlu1 %v2150_v15 }
 0xa5e   :  { %s2573_s4 = spop %2572 }
 0xa5f   :  { %s1702_s5 = smul.f32 0.0625, %s2573_s4  ;;  %s2575_s29 = spop %2574 }
 0xa60   :  { %s1729_s0 = smul.f32 0.020833334, %s2575_s29 }
 0xa61   :  { %s3190_s15 = sadd.f32 %s1702_s5, %s671_s27 }
 0xa62   :  { %s1730_s12 = sadd.f32 %s1729_s0, %s699_s18 }
 0xa63   :  { %s2191_s7 = smul.f32 0.5, %s3190_s15 }
 0xa64   :  { %s2192_s24 = smul.f32 0.5, %s1730_s12 }
 0xa65   :  { %s2197_s19 = smul.f32 0.1, %s2191_s7  ;;  %v2209_v4 = vstv %s2191_s7 }
 0xa66   :  { %v2210_v35 = vsel %vm2208_vm0, %v2209_v4, 0.0  ;;  %v2213_v2 = vstv %s2192_s24  ;;  %s2199_s27 = smul.f32 0.1, %s2192_s24  ;;  %s2696_s24 = smov [#allocation5]  }
 0xa67   :  { %s2198_s2 = sadd.f32 %s2197_s19, %s2196_s23  ;;  %v2211_v16 = vadd.f32 %v2210_v35, %v2207_v1  ;;  %v2214_v7 = vsel %vm2212_vm9, %v2213_v2, 0.0 }
 0xa69   :  { %s3205_s15 = sadd.f32 %s2199_s27, %s2198_s2  ;;  %v2215_v45 = vadd.f32 %v2214_v7, %v2211_v16 }
 0xac9   :  { %v2118_v54 = vpop.xlane.xlu1 %2117 }
 0xaca   :  { %v2119_v49 = vrot.slane %v2118_v54, 4 }
 0xacc   :  { %v2120_v39 = vadd.f32 %v2119_v49, %v2118_v54 }
 0xacd   :  { %v2152_v56 = vpop.xlane.xlu1 %2151 }
 0xace   :  { %v2121_v58 = vrot.slane %v2120_v39, 2  ;;  %v2153_v50 = vrot.slane %v2152_v56, 4 }
 0xad0   :  { %v2154_v60 = vadd.f32 %v2153_v50, %v2152_v56  ;;  %v2122_v61 = vadd.f32 %v2121_v58, %v2120_v39 }
 0xad2   :  { %v2155_v51 = vrot.slane %v2154_v60, 2  ;;  %v2123_v48 = vrot.slane %v2122_v61, 1 }
 0xad4   :  { %v2156_v14 = vadd.f32 %v2155_v51, %v2154_v60  ;;  %v2124_v62 = vadd.f32 %v2123_v48, %v2122_v61 }
 0xad6   :  { %2576 = vpush %v2124_v62  ;;  %v2157_v29 = vrot.slane %v2156_v14, 1 }
 0xad7   :  { %2578 = vpush %v2143_v0 }
 0xad8   :  { %v2158_v9 = vadd.f32 %v2157_v29, %v2156_v14 }
 0xada   :  { %2580 = vpush %v2158_v9 }
 0xb07   :  { %s2577_s11 = spop %2576 }
 0xb08   :  { %s2128_s6 = smul.f32 0.015625, %s2577_s11  ;;  %s2579_s26 = spop %2578 }
 0xb09   :  { %s2145_s9 = sadd.f32 %s2579_s26, %s3086_s10 }
 0xb0a   :  { %s2129_s22 = sadd.f32 %s2128_s6, %s1098_s3  ;;  %s2695_s3 = smov [#allocation3]  }
 0xb0b   :  { %s3202_s4 = ssub.f32 0.0, %s2145_s9  ;;  %s2581_s0 = spop %2580 }
 0xb0c   :  { %s2193_s5 = smul.f32 0.5, %s2129_s22  ;;  %s3215_s7 = sadd.f32 %s2581_s0, %s3086_s10 }
 0xb0d   :  { %s2163_s21 = sand.u32 2147483647, %s3202_s4  ;;  %s2242_s23 = sshll.u32 %s2695_s3, 4  ;;  %s2243_s23 = int_to_ptr.vmem [resolvable:$true] %s2242_s23 }
 0xb0e   :  { %s3208_s28 = smul.f32 0.35, %s2193_s5  ;;  %v2217_v46 = vstv %s2193_s5  ;;  %s2164_s29 = ssub.f32 0.0, %s2163_s21 }
 0xb0f   :  { %v2218_v5 = vsel %vm2216_vm3, %v2217_v46, 0.0  ;;  %s2176_s18 = sand.u32 2147483647, %s3215_s7  ;;  %s2254_s10 = sshll.u32 %s2696_s24, 4  ;;  %s3218_s10 = int_to_ptr.vmem [resolvable:$true] %s2254_s10 }
 0xb10   :  { %s2202_s30 = sadd.f32 %s3208_s28, %s3205_s15  ;;  %v3212_v6 = vadd.f32 %v2218_v5, %v2215_v45  ;;  %v2165_v10 = vstv %s2164_s29  ;;  %s2641_s2 = scalar_lea.vmem %s2243_s23, 128 }
 0xb11   :  { %v2166_v17 = vmul.f32 1.442695, %v2165_v10  ;;  %s2177_s8 = ssub.f32 0.0, %s2176_s18  ;;  %p2642_p0 = scmp.ne.s32.totalorder %s2243_s23, %s2641_s2 }
 0xb12   :  { %p2646_p1 = scmp.lt.s32.totalorder %s2243_s23, %s2243_s23  ;;  %p2647_p2 = scmp.lt.s32.totalorder %s2641_s2, %s2641_s2 }
 0xb13   :  { %2632 = vpow2.f32 %v2166_v17  ;;  %v2178_v47 = vstv %s2177_s8 }
 0xb14   :  { %v2179_v23 = vmul.f32 1.442695, %v2178_v47  ;;  %p2648_p3 = por %p2647_p2, %p2646_p1 }
 0xb16   :  { %p2649_p4 = pnand %p2648_p3, %p2642_p0 }
 0xb1d   :  { %v2633_v20 = vpop.eup %2632 }
 0xb1e   :  { %2582 = vpush %v2633_v20 }
 0xb4f   :  { %s2583_s12 = spop %2582 }
 0xb50   :  { %s2169_s19 = sadd.f32 1.0, %s2583_s12 }
 0xb52   :  { %v2170_v36 = vstv %s2169_s19 }
 0xb53   :  { %2634 = vlog2.f32 %v2170_v36 }
 0xb54   :  { %2636 = vpow2.f32 %v2179_v23 }
 0xb5d   :  { %v2635_v21 = vpop.eup %2634 }
 0xb5e   :  { %v2172_v22 = vmul.f32 0.6931472, %v2635_v21  ;;  %v2637_v57 = vpop.eup %2636 }
 0xb60   :  { %2584 = vpush %v2172_v22 }
 0xb61   :  { %2586 = vpush %v2637_v57 }
 0xb62   :  { %2652 = shalt.err (!%p2649_p4)
}
 0xb63   :  { %s2653_s26 = scalar_lea.hbm %s3280_s13, 128 }
 0xb64   :  { %p2654_p5 = scmp.ne.s32.totalorder %s3280_s13, %s2653_s26  ;;  %p2657_p6 = scmp.lt.u32.totalorder %s2653_s26, %s3280_s13 }
 0xb66   :  { %p2659_p7 = pnand %p2657_p6, %p2654_p5 }
 0xb68   :  { %2662 = shalt.err (!%p2659_p7)
}
 0xb69   :  { %s2697_s21 = smov 64   ;;  %s2698_s29 = smov 4  }
 0xb6a   :  { %2248 = dma.vmem_to_hbm [thread:$0]  %s2243_s23, 128, %s3280_s13, [#allocation4], %s2697_s21, %s2697_s21, %s2698_s29  }
 0xb6b   :  { %s2663_s8 = scalar_lea.vmem %s3218_s10, 256  ;;  %p2668_p9 = scmp.lt.s32.totalorder %s3218_s10, %s3218_s10 }
 0xb6c   :  { %p2664_p8 = scmp.ne.s32.totalorder %s3218_s10, %s2663_s8  ;;  %p2669_p10 = scmp.lt.s32.totalorder %s2663_s8, %s2663_s8 }
 0xb6e   :  { %p2670_p11 = por %p2669_p10, %p2668_p9 }
 0xb70   :  { %p2671_p12 = pnand %p2670_p11, %p2664_p8 }
 0xb72   :  { %2674 = shalt.err (!%p2671_p12)
}
 0xb73   :  { %s2675_s3 = scalar_lea.hbm %s3281_s14, 256 }
 0xb74   :  { %p2676_p13 = scmp.ne.s32.totalorder %s3281_s14, %s2675_s3  ;;  %p2679_p0 = scmp.lt.u32.totalorder %s2675_s3, %s3281_s14 }
 0xb76   :  { %p2681_p1 = pnand %p2679_p0, %p2676_p13 }
 0xb78   :  { %2684 = shalt.err (!%p2681_p1)
}
 0xb79   :  { %s2699_s13 = smov 128   ;;  %s2700_s23 = smov 8   ;;  %vm2220_vm4 = vcmp.eq.s32.totalorder %v2847_v24, 4  ;;  %vm2224_vm1 = vcmp.eq.s32.totalorder %v2847_v24, 5  ;;  %vm2228_vm5 = vcmp.eq.s32.totalorder %v2847_v24, 6  ;;  %vm2232_vm6 = vcmp.eq.s32.totalorder %v2847_v24, 7 }
 0xb7a   :  { %2260 = dma.vmem_to_hbm [thread:$0]  %s3218_s10, 256, %s3281_s14, [#allocation6], %s2699_s13, %s2699_s13, %s2700_s23  }
 0xb7b   :  { %s2162_s22 = smax.f32 %s2694_s17, %s3202_s4  ;;  %s1541_s0 = smul.f32 0.0078125, %s3185_s25 }
 0xb7c   :  { %s501_s18 = smul.f32 0.0078125, %s3088_s20  ;;  %s2175_s12 = smax.f32 %s2694_s17, %s3215_s7 }
 0xb7e   :  { %s1542_s8 = sadd.f32 %s1541_s0, %s501_s18 }
 0xb80   :  { %s2195_s19 = smul.f32 0.5, %s1542_s8 }
 0xb82   :  { %v2225_v27 = vstv %s2195_s19 }
 0xb83   :  { %v2226_v59 = vsel %vm2224_vm1, %v2225_v27, 0.0 }
 0xb91   :  { %s2585_s27 = spop %2584 }
 0xb92   :  { %s2174_s5 = sadd.f32 %s2585_s27, %s2162_s22  ;;  %s2587_s21 = spop %2586 }
 0xb93   :  { %s2182_s29 = sadd.f32 1.0, %s2587_s21 }
 0xb95   :  { %v2183_v25 = vstv %s2182_s29 }
 0xb96   :  { %2638 = vlog2.f32 %v2183_v25 }
 0xba0   :  { %v2639_v52 = vpop.eup %2638 }
 0xba1   :  { %v2185_v26 = vmul.f32 0.6931472, %v2639_v52 }
 0xba3   :  { %2588 = vpush %v2185_v26 }
 0xbd4   :  { %s2589_s14 = spop %2588 }
 0xbd5   :  { %s2187_s10 = sadd.f32 %s2589_s14, %s2175_s12 }
 0xbd7   :  { %s2188_s4 = sadd.f32 %s2187_s10, %s2174_s5 }
 0xbd9   :  { %s2189_s3 = sadd.f32 %s2188_s4, %s3132_s1 }
 0xbdb   :  { %s2194_s24 = smul.f32 0.5, %s2189_s3 }
 0xbdd   :  { %s2203_s2 = smul.f32 0.35, %s2194_s24  ;;  %v2221_v28 = vstv %s2194_s24 }
 0xbde   :  { %v2222_v13 = vsel %vm2220_vm4, %v2221_v28, 0.0 }
 0xbdf   :  { %s2204_s25 = sadd.f32 %s2203_s2, %s2202_s30  ;;  %v2223_v30 = vadd.f32 %v2222_v13, %v3212_v6 }
 0xbe1   :  { %s2205_s20 = sadd.f32 %s2204_s25, %s2195_s19  ;;  %v2227_v31 = vadd.f32 %v2226_v59, %v2223_v30  ;;  %v2229_v32 = vstv %s2204_s25 }
 0xbe2   :  { %v2230_v33 = vsel %vm2228_vm5, %v2229_v32, 0.0 }
 0xbe3   :  { %v2231_v8 = vadd.f32 %v2230_v33, %v2227_v31  ;;  %v2233_v37 = vstv %s2205_s20 }
 0xbe4   :  { %v2234_v34 = vsel %vm2232_vm6, %v2233_v37, 0.0 }
 0xbe5   :  { %v2235_v12 = vadd.f32 %v2234_v34, %v2231_v8 }
 0xbe7   :  { %2236 = vst [vmem:[%s3283_s16] sm:$0x1] %v2235_v12 }
 0xbe8   :  { %2685 = dma.done.wait [#allocation4], 128  }
 0xbe9   :  { %2686 = vsyncadd [#allocation4], 4294967168 }
 0xbea   :  { %2687 = dma.done.wait [#allocation6], 256  }
 0xbeb   :  { %2688 = vsyncadd [#allocation6], 4294967040 }
 0xbec   :  { %2275 = vsyncpa [#allocation4], 1 }
 0xbed   :  { %2276 = vsyncpa [#allocation6], 1 }

</bundles_post_ra>
